<compile_context>
chip_gen: v7x
topology: tpu7x:2x2x1
jax: 0.10.0
libtpu: 0.0.40
codegen_flags: <defaults>
</compile_context>

<pallas_src>
import functools

import jax
import jax.numpy as jnp
from jax.experimental import pallas as pl
from jax.experimental.pallas import tpu as pltpu

_EPS = 1e-5


def _vmem_limit_bytes():
    """~3/4 of physical VMEM (v5e/v6e: 128 MiB -> 96 MiB cap, v7x: 64 MiB -> 48 MiB)."""
    try:
        cap = pltpu.get_tpu_info().vmem_capacity_bytes
    except Exception:
        cap = 64 * 1024 * 1024
    return int(min(96 * 1024 * 1024, (cap * 3) // 4))


def _compiler_params(n_axes):
    return pltpu.CompilerParams(
        dimension_semantics=("parallel",) * n_axes,
        vmem_limit_bytes=_vmem_limit_bytes())


# ----------------------------------------------------------------------------- stage-1 kernel
def _deconv_stats_kernel(x_ref, w_ref, raw_ref, stats_ref, *, WC_in):
    """ConvTranspose2d(3, s=2, p=1, op=1) via 4 sub-pixel phases; one MXU matmul per image.

    x_ref     : (1, H, W*Cin)        input slab (f32), whole image of one batch element
    w_ref     : (2*W*Cin, 2*2W*Cout) banded phase weight bf16; rows (dh, w_in, ci), cols (de, w, do, co)
    raw_ref   : (1, H, 2*2W*Cout)    raw pre-BN output bf16 ((N,H,2*W2C) == (N,2H,W2C) reinterpreted)
    stats_ref : (1, 2, 2*2W*Cout)    per-lane [sum, sum_sq] in f32 (folded to per-channel on host)
    """
    img = x_ref[0]                                                      # (H, W*Cin) f32
    zrow = jnp.zeros((1, WC_in), jnp.float32)
    tap1 = jnp.concatenate([img[1:], zrow], axis=0)                     # rows h+1 (zero bottom pad)
    lhs = jnp.concatenate([img, tap1], axis=1).astype(jnp.bfloat16)     # (H, 2*W*Cin)
    acc = jnp.dot(lhs, w_ref[...], preferred_element_type=jnp.float32)  # (H, 2*W2C) f32
    s = jnp.sum(acc, axis=0, keepdims=True)
    ss = jnp.sum(acc * acc, axis=0, keepdims=True)
    stats_ref[...] = jnp.concatenate([s, ss], axis=0)[None]
    raw_ref[...] = acc[None].astype(raw_ref.dtype)


def deconv_stats(x_slab, w_banded):
    N, H, WCin = x_slab.shape
    out_lanes = w_banded.shape[1]
    kernel = functools.partial(_deconv_stats_kernel, WC_in=WCin)
    return pl.pallas_call(
        kernel,
        out_shape=(jax.ShapeDtypeStruct((N, H, out_lanes), jnp.bfloat16),
                   jax.ShapeDtypeStruct((N, 2, out_lanes), jnp.float32)),
        grid_spec=pltpu.PrefetchScalarGridSpec(
            num_scalar_prefetch=0,
            grid=(N,),
            in_specs=[pl.BlockSpec((1, H, WCin), lambda b: (b, 0, 0)),
                      pl.BlockSpec(w_banded.shape, lambda b: (0, 0))],
            out_specs=[pl.BlockSpec((1, H, out_lanes), lambda b: (b, 0, 0)),
                       pl.BlockSpec((1, 2, out_lanes), lambda b: (b, 0, 0))]),
        compiler_params=_compiler_params(1),
    )(x_slab, w_banded)


# -------------------------------------------------------------------------- stage-2/3 kernel
def _bn_relu_conv_stats_kernel(x_ref, scale_ref, shift_ref, w_ref, raw_ref, stats_ref, *, WC):
    """Fused [previous-stage BN apply + ReLU] + 3x3/pad-1 conv + BN partial stats.

    x_ref     : (1, H, W*C)   previous stage raw (pre-BN) slab, bf16
    scale_ref : (1, W*C)      previous-stage BN scale, width-tiled (f32, resident)
    shift_ref : (1, W*C)      previous-stage BN shift, width-tiled (f32, resident)
    w_ref     : (3*W*C, W*C)  width-banded 3x3 conv weight, bf16
    raw_ref   : (1, H, W*C)   this stage's raw pre-BN output, bf16
    stats_ref : (1, 2, W*C)   per-lane [sum, sum_sq], f32
    """
    act = jnp.maximum(x_ref[0].astype(jnp.float32) * scale_ref[...] + shift_ref[...], 0.0)  # (H, WC)
    zrow = jnp.zeros((1, WC), jnp.float32)
    up = jnp.concatenate([zrow, act[:-1]], axis=0)       # rows h-1 (zero top pad)
    down = jnp.concatenate([act[1:], zrow], axis=0)      # rows h+1 (zero bottom pad)
    lhs = jnp.concatenate([up, act, down], axis=1).astype(jnp.bfloat16)   # (H, 3*WC)
    acc = jnp.dot(lhs, w_ref[...], preferred_element_type=jnp.float32)    # (H, WC) f32
    s = jnp.sum(acc, axis=0, keepdims=True)
    ss = jnp.sum(acc * acc, axis=0, keepdims=True)
    stats_ref[...] = jnp.concatenate([s, ss], axis=0)[None]
    raw_ref[...] = acc[None].astype(raw_ref.dtype)


def bn_relu_conv_stats(prev_raw, scale_row, shift_row, w_banded):
    N, H, WC = prev_raw.shape
    assert w_banded.shape == (3 * WC, WC), (w_banded.shape, WC)
    kernel = functools.partial(_bn_relu_conv_stats_kernel, WC=WC)
    return pl.pallas_call(
        kernel,
        out_shape=(jax.ShapeDtypeStruct((N, H, WC), jnp.bfloat16),
                   jax.ShapeDtypeStruct((N, 2, WC), jnp.float32)),
        grid_spec=pltpu.PrefetchScalarGridSpec(
            num_scalar_prefetch=0,
            grid=(N,),
            in_specs=[pl.BlockSpec((1, H, WC), lambda b: (b, 0, 0)),
                      pl.BlockSpec((1, WC), lambda b: (0, 0)),
                      pl.BlockSpec((1, WC), lambda b: (0, 0)),
                      pl.BlockSpec(w_banded.shape, lambda b: (0, 0))],
            out_specs=[pl.BlockSpec((1, H, WC), lambda b: (b, 0, 0)),
                       pl.BlockSpec((1, 2, WC), lambda b: (b, 0, 0))]),
        compiler_params=_compiler_params(1),
    )(prev_raw, scale_row, shift_row, w_banded)


# -------------------------------------------------------------------------- final BN(+ReLU)
def _bn_act_kernel(x_ref, scale_ref, shift_ref, o_ref, *, relu):
    y = x_ref[0].astype(jnp.float32) * scale_ref[...] + shift_ref[...]
    if relu:
        y = jnp.maximum(y, 0.0)
    o_ref[...] = y[None]


def bn_act(raw_slab, scale_row, shift_row, *, relu):
    N, H, WC = raw_slab.shape
    kernel = functools.partial(_bn_act_kernel, relu=relu)
    return pl.pallas_call(
        kernel,
        out_shape=jax.ShapeDtypeStruct((N, H, WC), jnp.float32),
        grid_spec=pltpu.PrefetchScalarGridSpec(
            num_scalar_prefetch=0,
            grid=(N,),
            in_specs=[pl.BlockSpec((1, H, WC), lambda b: (b, 0, 0)),
                      pl.BlockSpec((1, WC), lambda b: (0, 0)),
                      pl.BlockSpec((1, WC), lambda b: (0, 0))],
            out_specs=pl.BlockSpec((1, H, WC), lambda b: (b, 0, 0))),
        compiler_params=_compiler_params(1),
    )(raw_slab, scale_row, shift_row)


# ------------------------------------------------------------------------------- BN host glue
def _bn_scale_shift(stats, gamma, beta, count, eps=_EPS):
    """Fold per-lane [sum, sum_sq] partials to per-channel scale/shift (tiny XLA op)."""
    cout = gamma.shape[0]
    s = jnp.sum(stats[:, 0, :], axis=0).reshape(-1, cout).sum(axis=0)
    ss = jnp.sum(stats[:, 1, :], axis=0).reshape(-1, cout).sum(axis=0)
    mean = s / count
    var = jnp.maximum(ss / count - mean * mean, 0.0)     # biased variance (PyTorch BN forward)
    scale = gamma * jax.lax.rsqrt(var + eps)
    shift = beta - mean * scale
    return scale, shift


def _tile_row(vec, reps):
    return jnp.tile(vec, reps).reshape(1, -1)            # lane order (w, c)


# --------------------------------------------------------------------------------- parameters
def init_decoder_block_params(key, in_channel, out_channel):
    """PyTorch-layout parameters of DecoderBlock (deterministic random)."""
    ks = jax.random.split(key, 9)
    params = dict(
        wt=0.1 * jax.random.normal(ks[0], (in_channel, out_channel, 3, 3), jnp.float32),
        w2=0.1 * jax.random.normal(ks[1], (out_channel, out_channel, 3, 3), jnp.float32),
        w3=0.1 * jax.random.normal(ks[2], (out_channel, out_channel, 3, 3), jnp.float32),
    )
    for i, name in enumerate(("1", "2", "3")):
        params["g" + name] = 1.0 + 0.1 * jax.random.normal(ks[3 + i], (out_channel,), jnp.float32)
        params["b" + name] = 0.1 * jax.random.normal(ks[6 + i], (out_channel,), jnp.float32)
    return params


def _banded_conv3x3_weight(w_oihw, W):
    """Width-banded weight for a 3x3 / pad-1 conv on lane-dense rows.

    Returns (3*W*Cin, W*Cout) bf16; rows ordered (dh, w_in, ci), cols (w_out, co).  Width zero
    padding is implicit: out-of-range taps simply have no band entry."""
    w = jnp.transpose(w_oihw, (2, 3, 1, 0)).astype(jnp.float32)       # (kh, kw, ci, co)
    cin, cout = w.shape[2], w.shape[3]
    blocks = []
    for dh in range(3):
        blk = jnp.zeros((W, cin, W, cout), jnp.float32)
        for dw in range(3):
            band = jnp.eye(W, W, k=1 - dw, dtype=jnp.float32)         # w_in = w_out + dw - 1
            blk = blk + jnp.einsum("pq,ij->piqj", band, w[dh, dw])
        blocks.append(blk.reshape(W * cin, W * cout))
    return jnp.concatenate(blocks, axis=0).astype(jnp.bfloat16)


def _banded_deconv_weight(wt_iohw, W):
    """Banded 4-phase weight for ConvTranspose2d(k=3, s=2, p=1, op=1) on lane-dense rows.

    Returns (2*W*Cin, 2*(2W*Cout)) bf16; rows (dh, w_in, ci), cols (de, w_out, do, co):
    output pixel (2h+de, 2w+do, co) = sum over (dh, dw, ci) of x[h+dh, w+dw, ci] * wt[ci, co, kh, kw]."""
    cin, cout = wt_iohw.shape[0], wt_iohw.shape[1]
    wt = wt_iohw.astype(jnp.float32)

    def k_idx(parity, tap):   # kernel index feeding output parity `parity` from input tap offset
        if parity == 0:
            return 1 if tap == 0 else None
        return 2 if tap == 0 else 0

    de_blocks = []
    for de in (0, 1):
        dh_blocks = []
        for dh in (0, 1):
            blk = jnp.zeros((W, cin, W, 2, cout), jnp.float32)
            for do in (0, 1):
                for dw in (0, 1):
                    kh, kw = k_idx(de, dh), k_idx(do, dw)
                    if kh is None or kw is None:
                        continue
                    band = jnp.eye(W, W, k=-dw, dtype=jnp.float32)    # w_in = w_out + dw
                    blk = blk.at[:, :, :, do, :].add(
                        jnp.einsum("pq,ij->piqj", band, wt[:, :, kh, kw]))
            dh_blocks.append(blk.reshape(W * cin, W * 2 * cout))
        de_blocks.append(jnp.concatenate(dh_blocks, axis=0))          # (2*W*Cin, 2W*Cout)
    return jnp.concatenate(de_blocks, axis=1).astype(jnp.bfloat16)    # (2*W*Cin, 2*(2W*Cout))


def prepare_pallas_params(params, *, in_width):
    """Pre-build the banded bf16 MXU weights (tied to the input spatial width)."""
    p = dict(params)
    p["w1_band"] = _banded_deconv_weight(params["wt"], in_width)
    p["w2_band"] = _banded_conv3x3_weight(params["w2"], 2 * in_width)
    p["w3_band"] = _banded_conv3x3_weight(params["w3"], 2 * in_width)
    return p


# ------------------------------------------------------------------------------ module forward
def decoder_block_forward(x_nchw, params, *, is_last_layer=False):
    """DecoderBlock forward: (N, Cin, H, W) -> (N, Cout, 2H, 2W).  Batch-stat BN (training mode)."""
    cout = params["g1"].shape[0]
    N, cin, H, W = x_nchw.shape
    H2, W2 = 2 * H, 2 * W
    wc2 = W2 * cout

    # NCHW -> lane-dense (N, H, W*Cin) slab (one small XLA transpose at the module boundary).
    x_slab = jnp.transpose(x_nchw, (0, 2, 3, 1)).reshape(N, H, W * cin).astype(jnp.float32)

    # --- Stage 1: ConvTranspose2d(3, s=2, p=1, op=1) via 4 sub-pixel phases (one matmul) ---
    raw1, st1 = deconv_stats(x_slab, params["w1_band"])
    raw1 = raw1.reshape(N, H2, wc2)   # (de, w, do, co) lanes -> row-parity interleave: free metadata reshape
    sc1, sh1 = _bn_scale_shift(st1, params["g1"], params["b1"], count=float(N * H2 * W2))

    # --- Stage 2: [BN1 + ReLU fused] + Conv2d 3x3 ---
    raw2, st2 = bn_relu_conv_stats(raw1, _tile_row(sc1, W2), _tile_row(sh1, W2), params["w2_band"])
    sc2, sh2 = _bn_scale_shift(st2, params["g2"], params["b2"], count=float(N * H2 * W2))

    # --- Stage 3: [BN2 + ReLU fused] + Conv2d 3x3 ---
    raw3, st3 = bn_relu_conv_stats(raw2, _tile_row(sc2, W2), _tile_row(sh2, W2), params["w3_band"])
    sc3, sh3 = _bn_scale_shift(st3, params["g3"], params["b3"], count=float(N * H2 * W2))

    # --- Final BN3 (+ ReLU unless last layer) ---
    y = bn_act(raw3, _tile_row(sc3, W2), _tile_row(sh3, W2), relu=not is_last_layer)

    return jnp.transpose(y.reshape(N, H2, W2, cout), (0, 3, 1, 2))    # NHWC -> NCHW


# --------------------------------------------------------------------------- pure-XLA reference
def _ref_forward(x_nchw, params, *, is_last_layer=False, eps=_EPS):
    """Reference with the kernel's precision policy: bf16 conv operands, f32 accumulation, f32 BN
    statistics, bf16 storage of the raw pre-BN intermediates."""
    x = jnp.transpose(x_nchw, (0, 2, 3, 1)).astype(jnp.float32)
    dn = ("NHWC", "HWIO", "NHWC")

    def conv(z, w_hwio, pad, lhs_dil=(1, 1)):
        return jax.lax.conv_general_dilated(
            z.astype(jnp.bfloat16), w_hwio.astype(jnp.bfloat16), (1, 1), pad,
            lhs_dilation=lhs_dil, dimension_numbers=dn,
            preferred_element_type=jnp.float32)

    def bn(raw, g, b, relu):
        m = jnp.mean(raw, axis=(0, 1, 2), keepdims=True)
        v = jnp.mean((raw - m) ** 2, axis=(0, 1, 2), keepdims=True)
        z = raw.astype(jnp.bfloat16).astype(jnp.float32)        # raw intermediates stored in bf16
        z = (z - m) * jax.lax.rsqrt(v + eps) * g + b
        return jnp.maximum(z, 0.0) if relu else z

    w_t = jnp.transpose(params["wt"][:, :, ::-1, ::-1], (2, 3, 0, 1))   # ConvT == flipped conv
    y = bn(conv(x, w_t, [(1, 2), (1, 2)], lhs_dil=(2, 2)), params["g1"], params["b1"], True)
    w2 = jnp.transpose(params["w2"], (2, 3, 1, 0))
    y = bn(conv(y, w2, [(1, 1), (1, 1)]), params["g2"], params["b2"], True)
    w3 = jnp.transpose(params["w3"], (2, 3, 1, 0))
    y = bn(conv(y, w3, [(1, 1), (1, 1)]), params["g3"], params["b3"], not is_last_layer)
    return jnp.transpose(y, (0, 3, 1, 2))


if __name__ == "__main__":
    in_channel, out_channel = 4, 8
    key = jax.random.PRNGKey(0)
    kx, kp = jax.random.split(key)
    x = jax.random.normal(kx, (2, in_channel, 16, 16), jnp.float32)     # NCHW, like PyTorch
    params = prepare_pallas_params(init_decoder_block_params(kp, in_channel, out_channel),
                                   in_width=16)

    fwd = jax.jit(functools.partial(decoder_block_forward, is_last_layer=False))
    out = jax.block_until_ready(fwd(x, params))
    assert out.shape == (2, out_channel, 32, 32), out.shape

    ref = jax.block_until_ready(_ref_forward(x, params, is_last_layer=False))
    err = float(jnp.max(jnp.abs(out - ref)))
    assert jnp.allclose(out, ref, rtol=1e-2, atol=2e-2), err

    print("KERNEL_OK")
</pallas_src>

<mosaic_0001>
module attributes {stable_mosaic.version = 11 : i64} {
  func.func @_deconv_stats_kernel(%arg0: i32, %arg1: memref<1x16x64xf32, #tpu.memory_space<vmem>>, %arg2: memref<128x512xbf16, #tpu.memory_space<vmem>>, %arg3: memref<1x16x512xbf16, #tpu.memory_space<vmem>>, %arg4: memref<1x2x512xf32, #tpu.memory_space<vmem>>) attributes {dimension_semantics = [#tpu.dimension_semantics<parallel>], iteration_bounds = array<i64: 2>, scalar_prefetch = 0 : i64, scratch_operands = 0 : i64, tpu.core_type = #tpu.core_type<tc>, window_params = [{transform_indices = @transform_0, window_bounds = array<i64: 1, 16, 64>}, {pipeline_mode = #tpu.pipeline_mode<synchronous>, transform_indices = @transform_1, window_bounds = array<i64: 128, 512>}, {transform_indices = @transform_2, window_bounds = array<i64: 1, 16, 512>}, {transform_indices = @transform_3, window_bounds = array<i64: 1, 2, 512>}]} {
    %c0 = arith.constant 0 : index
    %c0_0 = arith.constant 0 : index
    %c0_1 = arith.constant 0 : index
    %0 = vector.load %arg1[%c0, %c0_0, %c0_1] : memref<1x16x64xf32, #tpu.memory_space<vmem>>, vector<1x16x64xf32>
    %1 = vector.shape_cast %0 : vector<1x16x64xf32> to vector<16x64xf32>
    %cst = arith.constant 0.000000e+00 : f32
    %2 = vector.broadcast %cst : f32 to vector<1x64xf32>
    %3 = vector.extract_strided_slice %1 {offsets = [1, 0], sizes = [15, 64], strides = [1, 1]} : vector<16x64xf32> to vector<15x64xf32>
    %4 = tpu.concatenate %3, %2 in 0 : vector<15x64xf32>, vector<1x64xf32> -> vector<16x64xf32>
    %5 = tpu.concatenate %1, %4 in 1 : vector<16x64xf32>, vector<16x64xf32> -> vector<16x128xf32>
    %6 = arith.truncf %5 : vector<16x128xf32> to vector<16x128xbf16>
    %c0_2 = arith.constant 0 : index
    %c0_3 = arith.constant 0 : index
    %7 = vector.load %arg2[%c0_2, %c0_3] : memref<128x512xbf16, #tpu.memory_space<vmem>>, vector<128x512xbf16>
    %cst_4 = arith.constant dense<0.000000e+00> : vector<16x512xf32>
    %8 = tpu.matmul %6, %7, %cst_4 {dimension_numbers = #tpu.dot_dimension_numbers<[1], [0], [0], [1], [0, 0, 1, 1], [], []>} : vector<16x128xbf16>, vector<128x512xbf16>, vector<16x512xf32> -> vector<16x512xf32>
    %cst_5 = arith.constant dense<0.000000e+00> : vector<512xf32>
    %9 = vector.multi_reduction <add>, %8, %cst_5 [0] : vector<16x512xf32> to vector<512xf32>
    %10 = vector.shape_cast %9 : vector<512xf32> to vector<1x512xf32>
    %11 = arith.mulf %8, %8 : vector<16x512xf32>
    %cst_6 = arith.constant dense<0.000000e+00> : vector<512xf32>
    %12 = vector.multi_reduction <add>, %11, %cst_6 [0] : vector<16x512xf32> to vector<512xf32>
    %13 = vector.shape_cast %12 : vector<512xf32> to vector<1x512xf32>
    %14 = tpu.concatenate %10, %13 in 0 : vector<1x512xf32>, vector<1x512xf32> -> vector<2x512xf32>
    %15 = vector.shape_cast %14 : vector<2x512xf32> to vector<1x2x512xf32>
    %c0_7 = arith.constant 0 : index
    %c0_8 = arith.constant 0 : index
    %c0_9 = arith.constant 0 : index
    %16 = vector.load %arg4[%c0_7, %c0_8, %c0_9] : memref<1x2x512xf32, #tpu.memory_space<vmem>>, vector<1x2x512xf32>
    tpu.vector_store %arg4[%c0_7, %c0_8, %c0_9], %15 {strides = array<i32>} : memref<1x2x512xf32, #tpu.memory_space<vmem>>, vector<1x2x512xf32>,
    %17 = vector.shape_cast %8 : vector<16x512xf32> to vector<1x16x512xf32>
    %18 = arith.truncf %17 : vector<1x16x512xf32> to vector<1x16x512xbf16>
    %c0_10 = arith.constant 0 : index
    %c0_11 = arith.constant 0 : index
    %c0_12 = arith.constant 0 : index
    %19 = vector.load %arg3[%c0_10, %c0_11, %c0_12] : memref<1x16x512xbf16, #tpu.memory_space<vmem>>, vector<1x16x512xbf16>
    tpu.vector_store %arg3[%c0_10, %c0_11, %c0_12], %18 {strides = array<i32>} : memref<1x16x512xbf16, #tpu.memory_space<vmem>>, vector<1x16x512xbf16>,
    return
  }
  func.func @transform_0(%arg0: i32) -> (i32, i32, i32) {
    %c0_i32 = arith.constant 0 : i32
    %c0_i32_0 = arith.constant 0 : i32
    %c0_i32_1 = arith.constant 0 : i32
    return %arg0, %c0_i32, %c0_i32_0 : i32, i32, i32
  }
  func.func @transform_1(%arg0: i32) -> (i32, i32) {
    %c0_i32 = arith.constant 0 : i32
    %c0_i32_0 = arith.constant 0 : i32
    %c0_i32_1 = arith.constant 0 : i32
    return %c0_i32, %c0_i32_0 : i32, i32
  }
  func.func @transform_2(%arg0: i32) -> (i32, i32, i32) {
    %c0_i32 = arith.constant 0 : i32
    %c0_i32_0 = arith.constant 0 : i32
    %c0_i32_1 = arith.constant 0 : i32
    return %arg0, %c0_i32, %c0_i32_0 : i32, i32, i32
  }
  func.func @transform_3(%arg0: i32) -> (i32, i32, i32) {
    %c0_i32 = arith.constant 0 : i32
    %c0_i32_0 = arith.constant 0 : i32
    %c0_i32_1 = arith.constant 0 : i32
    return %arg0, %c0_i32, %c0_i32_0 : i32, i32, i32
  }
}

module attributes {stable_mosaic.version = 11 : i64} {
  func.func @_bn_relu_conv_stats_kernel(%arg0: i32, %arg1: memref<1x32x256xbf16, #tpu.memory_space<vmem>>, %arg2: memref<1x256xf32, #tpu.memory_space<vmem>>, %arg3: memref<1x256xf32, #tpu.memory_space<vmem>>, %arg4: memref<768x256xbf16, #tpu.memory_space<vmem>>, %arg5: memref<1x32x256xbf16, #tpu.memory_space<vmem>>, %arg6: memref<1x2x256xf32, #tpu.memory_space<vmem>>) attributes {dimension_semantics = [#tpu.dimension_semantics<parallel>], iteration_bounds = array<i64: 2>, scalar_prefetch = 0 : i64, scratch_operands = 0 : i64, tpu.core_type = #tpu.core_type<tc>, window_params = [{transform_indices = @transform_0, window_bounds = array<i64: 1, 32, 256>}, {pipeline_mode = #tpu.pipeline_mode<synchronous>, transform_indices = @transform_1, window_bounds = array<i64: 1, 256>}, {pipeline_mode = #tpu.pipeline_mode<synchronous>, transform_indices = @transform_2, window_bounds = array<i64: 1, 256>}, {pipeline_mode = #tpu.pipeline_mode<synchronous>, transform_indices = @transform_3, window_bounds = array<i64: 768, 256>}, {transform_indices = @transform_4, window_bounds = array<i64: 1, 32, 256>}, {transform_indices = @transform_5, window_bounds = array<i64: 1, 2, 256>}]} {
    %c0 = arith.constant 0 : index
    %c0_0 = arith.constant 0 : index
    %c0_1 = arith.constant 0 : index
    %0 = vector.load %arg1[%c0, %c0_0, %c0_1] : memref<1x32x256xbf16, #tpu.memory_space<vmem>>, vector<1x32x256xbf16>
    %1 = vector.shape_cast %0 : vector<1x32x256xbf16> to vector<32x256xbf16>
    %2 = arith.extf %1 : vector<32x256xbf16> to vector<32x256xf32>
    %c0_2 = arith.constant 0 : index
    %c0_3 = arith.constant 0 : index
    %3 = vector.load %arg2[%c0_2, %c0_3] : memref<1x256xf32, #tpu.memory_space<vmem>>, vector<1x256xf32>
    %4 = vector.broadcast %3 : vector<1x256xf32> to vector<32x256xf32>
    %5 = arith.mulf %2, %4 : vector<32x256xf32>
    %c0_4 = arith.constant 0 : index
    %c0_5 = arith.constant 0 : index
    %6 = vector.load %arg3[%c0_4, %c0_5] : memref<1x256xf32, #tpu.memory_space<vmem>>, vector<1x256xf32>
    %7 = vector.broadcast %6 : vector<1x256xf32> to vector<32x256xf32>
    %8 = arith.addf %5, %7 : vector<32x256xf32>
    %cst = arith.constant 0.000000e+00 : f32
    %9 = vector.broadcast %cst : f32 to vector<32x256xf32>
    %10 = arith.maximumf %8, %9 : vector<32x256xf32>
    %cst_6 = arith.constant 0.000000e+00 : f32
    %11 = vector.broadcast %cst_6 : f32 to vector<1x256xf32>
    %12 = vector.extract_strided_slice %10 {offsets = [0, 0], sizes = [31, 256], strides = [1, 1]} : vector<32x256xf32> to vector<31x256xf32>
    %13 = tpu.concatenate %11, %12 in 0 : vector<1x256xf32>, vector<31x256xf32> -> vector<32x256xf32>
    %14 = vector.extract_strided_slice %10 {offsets = [1, 0], sizes = [31, 256], strides = [1, 1]} : vector<32x256xf32> to vector<31x256xf32>
    %15 = tpu.concatenate %14, %11 in 0 : vector<31x256xf32>, vector<1x256xf32> -> vector<32x256xf32>
    %16 = tpu.concatenate %13, %10, %15 in 1 : vector<32x256xf32>, vector<32x256xf32>, vector<32x256xf32> -> vector<32x768xf32>
    %17 = arith.truncf %16 : vector<32x768xf32> to vector<32x768xbf16>
    %c0_7 = arith.constant 0 : index
    %c0_8 = arith.constant 0 : index
    %18 = vector.load %arg4[%c0_7, %c0_8] : memref<768x256xbf16, #tpu.memory_space<vmem>>, vector<768x256xbf16>
    %cst_9 = arith.constant dense<0.000000e+00> : vector<32x256xf32>
    %19 = tpu.matmul %17, %18, %cst_9 {dimension_numbers = #tpu.dot_dimension_numbers<[1], [0], [0], [1], [0, 0, 1, 1], [], []>} : vector<32x768xbf16>, vector<768x256xbf16>, vector<32x256xf32> -> vector<32x256xf32>
    %cst_10 = arith.constant dense<0.000000e+00> : vector<256xf32>
    %20 = vector.multi_reduction <add>, %19, %cst_10 [0] : vector<32x256xf32> to vector<256xf32>
    %21 = vector.shape_cast %20 : vector<256xf32> to vector<1x256xf32>
    %22 = arith.mulf %19, %19 : vector<32x256xf32>
    %cst_11 = arith.constant dense<0.000000e+00> : vector<256xf32>
    %23 = vector.multi_reduction <add>, %22, %cst_11 [0] : vector<32x256xf32> to vector<256xf32>
    %24 = vector.shape_cast %23 : vector<256xf32> to vector<1x256xf32>
    %25 = tpu.concatenate %21, %24 in 0 : vector<1x256xf32>, vector<1x256xf32> -> vector<2x256xf32>
    %26 = vector.shape_cast %25 : vector<2x256xf32> to vector<1x2x256xf32>
    %c0_12 = arith.constant 0 : index
    %c0_13 = arith.constant 0 : index
    %c0_14 = arith.constant 0 : index
    %27 = vector.load %arg6[%c0_12, %c0_13, %c0_14] : memref<1x2x256xf32, #tpu.memory_space<vmem>>, vector<1x2x256xf32>
    tpu.vector_store %arg6[%c0_12, %c0_13, %c0_14], %26 {strides = array<i32>} : memref<1x2x256xf32, #tpu.memory_space<vmem>>, vector<1x2x256xf32>,
    %28 = vector.shape_cast %19 : vector<32x256xf32> to vector<1x32x256xf32>
    %29 = arith.truncf %28 : vector<1x32x256xf32> to vector<1x32x256xbf16>
    %c0_15 = arith.constant 0 : index
    %c0_16 = arith.constant 0 : index
    %c0_17 = arith.constant 0 : index
    %30 = vector.load %arg5[%c0_15, %c0_16, %c0_17] : memref<1x32x256xbf16, #tpu.memory_space<vmem>>, vector<1x32x256xbf16>
    tpu.vector_store %arg5[%c0_15, %c0_16, %c0_17], %29 {strides = array<i32>} : memref<1x32x256xbf16, #tpu.memory_space<vmem>>, vector<1x32x256xbf16>,
    return
  }
  func.func @transform_0(%arg0: i32) -> (i32, i32, i32) {
    %c0_i32 = arith.constant 0 : i32
    %c0_i32_0 = arith.constant 0 : i32
    %c0_i32_1 = arith.constant 0 : i32
    return %arg0, %c0_i32, %c0_i32_0 : i32, i32, i32
  }
  func.func @transform_1(%arg0: i32) -> (i32, i32) {
    %c0_i32 = arith.constant 0 : i32
    %c0_i32_0 = arith.constant 0 : i32
    %c0_i32_1 = arith.constant 0 : i32
    return %c0_i32, %c0_i32_0 : i32, i32
  }
  func.func @transform_2(%arg0: i32) -> (i32, i32) {
    %c0_i32 = arith.constant 0 : i32
    %c0_i32_0 = arith.constant 0 : i32
    %c0_i32_1 = arith.constant 0 : i32
    return %c0_i32, %c0_i32_0 : i32, i32
  }
  func.func @transform_3(%arg0: i32) -> (i32, i32) {
    %c0_i32 = arith.constant 0 : i32
    %c0_i32_0 = arith.constant 0 : i32
    %c0_i32_1 = arith.constant 0 : i32
    return %c0_i32, %c0_i32_0 : i32, i32
  }
  func.func @transform_4(%arg0: i32) -> (i32, i32, i32) {
    %c0_i32 = arith.constant 0 : i32
    %c0_i32_0 = arith.constant 0 : i32
    %c0_i32_1 = arith.constant 0 : i32
    return %arg0, %c0_i32, %c0_i32_0 : i32, i32, i32
  }
  func.func @transform_5(%arg0: i32) -> (i32, i32, i32) {
    %c0_i32 = arith.constant 0 : i32
    %c0_i32_0 = arith.constant 0 : i32
    %c0_i32_1 = arith.constant 0 : i32
    return %arg0, %c0_i32, %c0_i32_0 : i32, i32, i32
  }
}

module attributes {stable_mosaic.version = 11 : i64} {
  func.func @_bn_act_kernel(%arg0: i32, %arg1: memref<1x32x256xbf16, #tpu.memory_space<vmem>>, %arg2: memref<1x256xf32, #tpu.memory_space<vmem>>, %arg3: memref<1x256xf32, #tpu.memory_space<vmem>>, %arg4: memref<1x32x256xf32, #tpu.memory_space<vmem>>) attributes {dimension_semantics = [#tpu.dimension_semantics<parallel>], iteration_bounds = array<i64: 2>, scalar_prefetch = 0 : i64, scratch_operands = 0 : i64, tpu.core_type = #tpu.core_type<tc>, window_params = [{transform_indices = @transform_0, window_bounds = array<i64: 1, 32, 256>}, {pipeline_mode = #tpu.pipeline_mode<synchronous>, transform_indices = @transform_1, window_bounds = array<i64: 1, 256>}, {pipeline_mode = #tpu.pipeline_mode<synchronous>, transform_indices = @transform_2, window_bounds = array<i64: 1, 256>}, {transform_indices = @transform_3, window_bounds = array<i64: 1, 32, 256>}]} {
    %c0 = arith.constant 0 : index
    %c0_0 = arith.constant 0 : index
    %c0_1 = arith.constant 0 : index
    %0 = vector.load %arg1[%c0, %c0_0, %c0_1] : memref<1x32x256xbf16, #tpu.memory_space<vmem>>, vector<1x32x256xbf16>
    %1 = vector.shape_cast %0 : vector<1x32x256xbf16> to vector<32x256xbf16>
    %2 = arith.extf %1 : vector<32x256xbf16> to vector<32x256xf32>
    %c0_2 = arith.constant 0 : index
    %c0_3 = arith.constant 0 : index
    %3 = vector.load %arg2[%c0_2, %c0_3] : memref<1x256xf32, #tpu.memory_space<vmem>>, vector<1x256xf32>
    %4 = vector.broadcast %3 : vector<1x256xf32> to vector<32x256xf32>
    %5 = arith.mulf %2, %4 : vector<32x256xf32>
    %c0_4 = arith.constant 0 : index
    %c0_5 = arith.constant 0 : index
    %6 = vector.load %arg3[%c0_4, %c0_5] : memref<1x256xf32, #tpu.memory_space<vmem>>, vector<1x256xf32>
    %7 = vector.broadcast %6 : vector<1x256xf32> to vector<32x256xf32>
    %8 = arith.addf %5, %7 : vector<32x256xf32>
    %cst = arith.constant 0.000000e+00 : f32
    %9 = vector.broadcast %cst : f32 to vector<32x256xf32>
    %10 = arith.maximumf %8, %9 : vector<32x256xf32>
    %11 = vector.shape_cast %10 : vector<32x256xf32> to vector<1x32x256xf32>
    %c0_6 = arith.constant 0 : index
    %c0_7 = arith.constant 0 : index
    %c0_8 = arith.constant 0 : index
    %12 = vector.load %arg4[%c0_6, %c0_7, %c0_8] : memref<1x32x256xf32, #tpu.memory_space<vmem>>, vector<1x32x256xf32>
    tpu.vector_store %arg4[%c0_6, %c0_7, %c0_8], %11 {strides = array<i32>} : memref<1x32x256xf32, #tpu.memory_space<vmem>>, vector<1x32x256xf32>,
    return
  }
  func.func @transform_0(%arg0: i32) -> (i32, i32, i32) {
    %c0_i32 = arith.constant 0 : i32
    %c0_i32_0 = arith.constant 0 : i32
    %c0_i32_1 = arith.constant 0 : i32
    return %arg0, %c0_i32, %c0_i32_0 : i32, i32, i32
  }
  func.func @transform_1(%arg0: i32) -> (i32, i32) {
    %c0_i32 = arith.constant 0 : i32
    %c0_i32_0 = arith.constant 0 : i32
    %c0_i32_1 = arith.constant 0 : i32
    return %c0_i32, %c0_i32_0 : i32, i32
  }
  func.func @transform_2(%arg0: i32) -> (i32, i32) {
    %c0_i32 = arith.constant 0 : i32
    %c0_i32_0 = arith.constant 0 : i32
    %c0_i32_1 = arith.constant 0 : i32
    return %c0_i32, %c0_i32_0 : i32, i32
  }
  func.func @transform_3(%arg0: i32) -> (i32, i32, i32) {
    %c0_i32 = arith.constant 0 : i32
    %c0_i32_0 = arith.constant 0 : i32
    %c0_i32_1 = arith.constant 0 : i32
    return %arg0, %c0_i32, %c0_i32_0 : i32, i32, i32
  }
}

</mosaic_0001>

<bundles_post_ra>
// kernel: tile.38
= control target key start
LH: loop header
LB: loop body
LE: loop exit
PB: predicated region body
PF: predicated region fallthrough
CT: control target
= control target key end

     0   :  { %s40_s0 = inlined_call_operand.vmem [shape: f32[8], index: 0, kind: input, shape index: {}]   ;;  %s41_s1 = inlined_call_operand.vmem [shape: f32[32,8], index: 1, kind: output, shape index: {}]  }
   0x1   :  { %v4_v0 = vld [vmem:[%s40_s0] ss:$0 sm:$0xff] }
   0x2   :  { %5 = vst [vmem:[%s41_s1] sm:$0xff] %v4_v0  ;;  %12 = vst [vmem:[%s41_s1 + $0x8] sm:$0xff] %v4_v0 }
   0x3   :  { %13 = vst [vmem:[%s41_s1 + $0x10] sm:$0xff] %v4_v0  ;;  %14 = vst [vmem:[%s41_s1 + $0x18] sm:$0xff] %v4_v0 }

// kernel: tile.39
= control target key start
LH: loop header
LB: loop body
LE: loop exit
PB: predicated region body
PF: predicated region fallthrough
CT: control target
= control target key end

     0   :  { %s7_s6 = smov 3  ;;  %s21_s9 = smov 3  ;;  %vm4_vm0 = vcmask 64512   ;;  %vm11_vm1 = vcmask 1048512   ;;  %vm18_vm2 = vcmask 982912   ;;  %vm25_vm3 = vcmask 917312   ;;  %s232_s0 = inlined_call_operand.vmem [shape: f32[32,8], index: 0, kind: input, shape index: {}]   ;;  %s233_s1 = inlined_call_operand.vmem [shape: f32[1,256], index: 1, kind: output, shape index: {}]  }
   0x1   :  { %v122_v0 = vld [vmem:[%s232_s0 + $0xf] ss:$16 sm:%s7_s6]   ;;  %s153_s10 = smov 120   ;;  %v124_v1 = vld [vmem:[%s232_s0 + $0xd] ss:$16 sm:%s21_s9]   ;;  %s14_s13 = smov 3 }
   0x2   :  { %9 = vrot.lane.b32.xlu0 %v122_v0, %s153_s10  ;;  %s154_s14 = smov 104   ;;  %v123_v2 = vld [vmem:[%s232_s0 + $0xe] ss:$16 sm:%s14_s13]   ;;  %s28_s17 = smov 3  ;;  %vm32_vm4 = vcmask 851712   ;;  %vm39_vm5 = vcmask 786112  }
   0x3   :  { %23 = vrot.lane.b32.xlu1 %v124_v1, %s154_s14  ;;  %v125_v3 = vld [vmem:[%s232_s0 + $0xc] ss:$16 sm:%s28_s17]   ;;  %s35_s20 = smov 3  ;;  %s42_s21 = smov 3  ;;  %vm46_vm6 = vcmask 720512   ;;  %vm53_vm7 = vcmask 654912  }
   0x4   :  { %s155_s22 = smov 112   ;;  %s156_s23 = smov 96   ;;  %v126_v4 = vld [vmem:[%s232_s0 + $0xb] ss:$16 sm:%s35_s20]   ;;  %v127_v5 = vld [vmem:[%s232_s0 + $0xa] ss:$16 sm:%s42_s21]  }
   0x5   :  { %s49_s28 = smov 3  ;;  %s56_s29 = smov 3  ;;  %vm60_vm8 = vcmask 589312   ;;  %vm67_vm9 = vcmask 523712   ;;  %vm74_vm10 = vcmask 458112   ;;  %vm81_vm11 = vcmask 392512  }
   0x6   :  { %16 = vrot.lane.b32.xlu0 %v123_v2, %s155_s22  ;;  %s157_s30 = smov 88   ;;  %s158_s2 = smov 80   ;;  %v128_v6 = vld [vmem:[%s232_s0 + $0x9] ss:$16 sm:%s49_s28]   ;;  %vm88_vm12 = vcmask 326912   ;;  %vm95_vm13 = vcmask 261312  }
   0x7   :  { %30 = vrot.lane.b32.xlu1 %v125_v3, %s156_s23  ;;  %v129_v7 = vld [vmem:[%s232_s0 + $0x8] ss:$16 sm:%s56_s29]   ;;  %s63_s7 = smov 3  ;;  %s70_s8 = smov 3  ;;  %vm102_vm14 = vcmask 195712   ;;  %vm109_vm15 = vcmask 130112  }
   0x8   :  { %s159_s9 = smov 72   ;;  %s160_s10 = smov 64   ;;  %v130_v8 = vld [vmem:[%s232_s0 + $0x7] ss:$16 sm:%s63_s7]   ;;  %v131_v9 = vld [vmem:[%s232_s0 + $0x6] ss:$16 sm:%s70_s8]  }
   0x9   :  { %s2_s13 = smov 3  ;;  %s77_s16 = smov 3 }
   0xa   :  { %37 = vrot.lane.b32.xlu0 %v126_v4, %s157_s30  ;;  %v3_v10 = vld [vmem:[%s232_s0] ss:$16 sm:%s2_s13]   ;;  %s84_s19 = smov 3  ;;  %s161_s20 = smov 56  }
   0xb   :  { %44 = vrot.lane.b32.xlu1 %v127_v5, %s158_s2  ;;  %5 = vst.msk [vmem:[#allocation0] ss:$8 sm:$0x3] %vm4_vm0, %v3_v10   ;;  %s162_s21 = smov 48   ;;  %v132_v11 = vld [vmem:[%s232_s0 + $0x5] ss:$16 sm:%s77_s16]  }
   0xc   :  { %v133_v12 = vld [vmem:[%s232_s0 + $0x4] ss:$16 sm:%s84_s19]   ;;  %s91_s26 = smov 3  ;;  %s98_s27 = smov 3 }
   0xd   :  { %s163_s28 = smov 40   ;;  %s164_s29 = smov 32   ;;  %v134_v13 = vld [vmem:[%s232_s0 + $0x3] ss:$16 sm:%s91_s26]   ;;  %v135_v14 = vld [vmem:[%s232_s0 + $0x2] ss:$16 sm:%s98_s27]  }
   0xe   :  { %51 = vrot.lane.b32.xlu0 %v128_v6, %s159_s9  ;;  %s105_s5 = smov 3  ;;  %s165_s6 = smov 24  }
   0xf   :  { %58 = vrot.lane.b32.xlu1 %v129_v7, %s160_s10  ;;  %s166_s7 = smov 16   ;;  %v136_v15 = vld [vmem:[%s232_s0 + $0x1] ss:$16 sm:%s105_s5]   ;;  %s167_s0 = smov 8  }
  0x12   :  { %65 = vrot.lane.b32.xlu0 %v130_v8, %s161_s20 }
  0x13   :  { %72 = vrot.lane.b32.xlu1 %v131_v9, %s162_s21 }
  0x16   :  { %79 = vrot.lane.b32.xlu0 %v132_v11, %s163_s28 }
  0x17   :  { %86 = vrot.lane.b32.xlu1 %v133_v12, %s164_s29 }
  0x1a   :  { %93 = vrot.lane.b32.xlu0 %v134_v13, %s165_s6 }
  0x1b   :  { %100 = vrot.lane.b32.xlu1 %v135_v14, %s166_s7 }
  0x1e   :  { %107 = vrot.lane.b32.xlu0 %v136_v15, %s167_s0 }
  0x74   :  { %v10_v16 = vpop.permute.xlu0 %9  }
  0x75   :  { %12 = vst.msk [vmem:[#allocation0] ss:$8 sm:$0x3] %vm11_vm1, %v10_v16   ;;  %v24_v17 = vpop.permute.xlu1 %23  }
  0x78   :  { %v17_v18 = vpop.permute.xlu0 %16  }
  0x79   :  { %19 = vst.msk [vmem:[#allocation0] ss:$8 sm:$0x3] %vm18_vm2, %v17_v18   ;;  %v31_v19 = vpop.permute.xlu1 %30  }
  0x7a   :  { %26 = vst.msk [vmem:[#allocation0] ss:$8 sm:$0x3] %vm25_vm3, %v24_v17  }
  0x7b   :  { %33 = vst.msk [vmem:[#allocation0] ss:$8 sm:$0x3] %vm32_vm4, %v31_v19  }
  0x7c   :  { %v38_v20 = vpop.permute.xlu0 %37  }
  0x7d   :  { %40 = vst.msk [vmem:[#allocation0] ss:$8 sm:$0x3] %vm39_vm5, %v38_v20   ;;  %v45_v21 = vpop.permute.xlu1 %44  }
  0x7e   :  { %47 = vst.msk [vmem:[#allocation0] ss:$8 sm:$0x3] %vm46_vm6, %v45_v21  }
  0x80   :  { %v52_v22 = vpop.permute.xlu0 %51  }
  0x81   :  { %54 = vst.msk [vmem:[#allocation0] ss:$8 sm:$0x3] %vm53_vm7, %v52_v22   ;;  %v59_v23 = vpop.permute.xlu1 %58  }
  0x82   :  { %61 = vst.msk [vmem:[#allocation0] ss:$8 sm:$0x3] %vm60_vm8, %v59_v23  }
  0x84   :  { %v66_v24 = vpop.permute.xlu0 %65  }
  0x85   :  { %68 = vst.msk [vmem:[#allocation0] ss:$8 sm:$0x3] %vm67_vm9, %v66_v24   ;;  %v73_v25 = vpop.permute.xlu1 %72  }
  0x86   :  { %75 = vst.msk [vmem:[#allocation0] ss:$8 sm:$0x3] %vm74_vm10, %v73_v25  }
  0x88   :  { %v80_v26 = vpop.permute.xlu0 %79  }
  0x89   :  { %82 = vst.msk [vmem:[#allocation0] ss:$8 sm:$0x3] %vm81_vm11, %v80_v26   ;;  %v87_v27 = vpop.permute.xlu1 %86  }
  0x8a   :  { %89 = vst.msk [vmem:[#allocation0] ss:$8 sm:$0x3] %vm88_vm12, %v87_v27  }
  0x8c   :  { %v94_v28 = vpop.permute.xlu0 %93  }
  0x8d   :  { %96 = vst.msk [vmem:[#allocation0] ss:$8 sm:$0x3] %vm95_vm13, %v94_v28   ;;  %v101_v29 = vpop.permute.xlu1 %100  }
  0x8e   :  { %103 = vst.msk [vmem:[#allocation0] ss:$8 sm:$0x3] %vm102_vm14, %v101_v29  }
  0x90   :  { %v108_v30 = vpop.permute.xlu0 %107  }
  0x91   :  { %110 = vst.msk [vmem:[#allocation0] ss:$8 sm:$0x3] %vm109_vm15, %v108_v30  }
  0x98   :  { %v114_v31 = vld [vmem:[#allocation0] sm:$0x1]  ;;  %v118_v32 = vld [vmem:[#allocation0 + $0x8] sm:$0x1] }
  0x99   :  { %116 = vst [vmem:[%s233_s1] sm:$0x1] %v114_v31  ;;  %137 = vst [vmem:[%s233_s1 + $0x1] sm:$0x1] %v118_v32 }

// kernel: decoder_block_forward.4
= control target key start
LH: loop header
LB: loop body
LE: loop exit
PB: predicated region body
PF: predicated region fallthrough
CT: control target
= control target key end

     0   :  { %9 = vsyncpa [#allocation3], 0  ;;  %s920_s12 = smov 0   ;;  %s1017_s0 = inlined_call_operand.vmem [shape: f32[2,16,64], index: 0, kind: input, shape index: {}]   ;;  %s1018_s1 = inlined_call_operand.hbm [shape: bf16[128,512], index: 1, kind: input, shape index: {}]   ;;  %s1019_s2 = inlined_call_operand.vmem [shape: bf16[2,16,512], index: 2, kind: output, shape index: {0}]   ;;  %s1020_s3 = inlined_call_operand.vmem [shape: f32[2,2,512], index: 3, kind: output, shape index: {1}]  }
   0x1 LB: > { %s926_s13 = sadd.s32 4294967295, %s892_s12   ;;  %p721_p0 = scmp.ge.s32.totalorder %s892_s12, 1  ;;  %s892_s12 = sphi %s920_s12, %s15_s12  }
   0x2   : > { %p119_p1 = scmp.lt.s32.totalorder %s892_s12, 3  ;;  %s894_s14 = smov [#allocation2]  }
   0x3   : > { %s131_s15 = sshll.u32 %s894_s14, 4  ;;  %p1021_p3 = scmp.eq.s32.totalorder %s926_s13, 0  ;;  %s132_s15 = int_to_ptr.vmem [resolvable:$true] %s131_s15 }
   0x4   : > { %p930_p2 = pnand %p721_p0, %p119_p1  ;;  %s854_s20 = scalar_lea.hbm %s1018_s1, 4096 }
   0x5   : > { %p855_p6 = scmp.ne.s32.totalorder %s1018_s1, %s854_s20  ;;  %p861_p10 = scmp.lt.u32.totalorder %s854_s20, %s1018_s1 }
   0x6   : > { %s1023_s16 = scalar_select %p930_p2, 1, 0 }
   0x7   : > { %p781_p4 = pneg %p930_p2 }
   0x9   : > { %p939_p5 = pnand %p1021_p3, %p781_p4 }
   0xb   : > { %p856_p7 = pneg %p939_p5 }
   0xd   : > { %p857_p8 = pnand %p856_p7, %p855_p6 }
   0xf   : > { %p858_p9 = pneg %p857_p8 }
  0x11   : > { %p863_p11 = pnand %p861_p10, %p858_p9 }
  0x13   : > { %866 = shalt.err (!%p863_p11)
}
  0x14   : > { %s867_s25 = scalar_lea.vmem %s132_s15, 4096  ;;  %p875_p1 = scmp.lt.s32.totalorder %s132_s15, %s132_s15 }
  0x15   : > { %p868_p12 = scmp.ne.s32.totalorder %s132_s15, %s867_s25  ;;  %p876_p4 = scmp.lt.s32.totalorder %s867_s25, %s867_s25 }
  0x17   : > { %p870_p13 = pnand %p868_p12, %p856_p7  ;;  %p877_p3 = por %p876_p4, %p875_p1 }
  0x19   : > { %p871_p0 = pneg %p870_p13 }
  0x1b   : > { %p878_p2 = pnand %p877_p3, %p871_p0 }
  0x1d   : > { %881 = shalt.err (!%p878_p2)
}
  0x1e   : > { %s895_s26 = smov 256   ;;  %s896_s27 = smov 16  }
  0x1f   : > { %784 = dma.hbm_to_vmem [thread:$0]  (!%p939_p5), %s1018_s1, 4096, %s132_s15, [#allocation3], %s895_s26, %s895_s26, %s896_s27  }
  0x20   : > { %p1025_p6 = scmp.ne.s32.totalorder %s1023_s16, 0 }
  0x21   : > { %p1026_p8 = scmp.eq.s32.totalorder (!%p1025_p6), %s926_s13, 0 }
  0x22   : > { %155 = sbr.rel (%p1025_p6) target bundleno = 414 (0x19e), region = 28 }
  0x29   : > { %887 = dma.done.wait (%p1026_p8), [#allocation3], 4096   ;;  %p1027_p7 = pmov %p1026_p8 }
  0x2a   : > { %p184_p2 = scmp.lt.s32.totalorder %s926_s13, 1  ;;  %v897_v0 = vmov 0   ;;  %vm204_vm0 = vcmask 1046528   ;;  %v806_v5 = vld [vmem:[#allocation2 + $0x4] ss:$16 sps:$4 sm:$0xff]   ;;  %s898_s7 = smov 64   ;;  %v577_v54 = vlaneseq }
  0x2b   : > { %889 = vsyncadd (%p1027_p7), [#allocation3], 4294963200  ;;  %445 = vmatprep.mubr.bf16.mxu0 %v897_v0  ;;  %488 = vmatprep.mubr.bf16.mxu1 %v897_v0  ;;  %v808_v6 = vld [vmem:[#allocation2 + $0xc] ss:$16 sps:$4 sm:$0xff]   ;;  %v810_v7 = vld [vmem:[#allocation2] ss:$16 sps:$4 sm:$0xff]  }
  0x2c   : > { %s1029_s13 = smov (!%p184_p2, %s926_s13), 1  ;;  %413 = vmatprep.subr.bf16.mxu0 %v806_v5  ;;  %v811_v10 = vld [vmem:[#allocation2 + $0x8] ss:$16 sps:$4 sm:$0xff]   ;;  %456 = vmatprep.subr.bf16.mxu1 %v808_v6  ;;  %v812_v12 = vld [vmem:[#allocation2 + $0x24] ss:$16 sps:$4 sm:$0xff]   ;;  %vm217_vm1 = vcmask 523264  }
  0x2d   : > { %s770_s30 = sshll.u32 %s1029_s13, 4  ;;  %414 = vmatpush1.bf16.msra.mxu0 %v810_v7  ;;  %457 = vmatpush1.bf16.msra.mxu1 %v811_v10  ;;  %v814_v13 = vld [vmem:[#allocation2 + $0x2c] ss:$16 sps:$4 sm:$0xff]   ;;  %v816_v14 = vld [vmem:[#allocation2 + $0x20] ss:$16 sps:$4 sm:$0xff]   ;;  %s771_s8 = sshll.u32 %s1029_s13, 5 }
  0x2e   : > { %s188_s6 = scalar_lea.vmem %s1017_s0, %s770_s30  ;;  %v817_v15 = vld [vmem:[#allocation2 + $0x28] ss:$16 sps:$4 sm:$0xff]   ;;  %415 = vmatprep.subr.bf16.mxu0 %v812_v12  ;;  %v818_v16 = vld [vmem:[#allocation2 + $0x44] ss:$16 sps:$4 sm:$0xff]   ;;  %458 = vmatprep.subr.bf16.mxu1 %v814_v13  ;;  %v820_v17 = vld [vmem:[#allocation2 + $0x4c] ss:$16 sps:$4 sm:$0xff]   ;;  %s985_s11 = scalar_lea.vmem %s1019_s2, %s771_s8 }
  0x2f   : > { %v973_v1 = vld [vmem:[%s188_s6] sm:$0xff]  ;;  %v975_v2 = vld [vmem:[%s188_s6 + $0x8] sm:$0xff]  ;;  %v899_v52 = vmov 1983009808   ;;  %vm563_vm2 = vcmask 1040384   ;;  %s772_s14 = sshll.u32 %s1029_s13, 3 }
  0x30   : > { %v205_v3 = vrot.slane %v973_v1, 1  ;;  %v206_v4 = vrot.slane %v975_v2, 1  ;;  %v822_v18 = vld [vmem:[#allocation2 + $0x40] ss:$16 sps:$4 sm:$0xff]   ;;  %v823_v19 = vld [vmem:[#allocation2 + $0x48] ss:$16 sps:$4 sm:$0xff]   ;;  %v987_v53 = vunpack.c.l.s4 %v899_v52  ;;  %s198_s17 = scalar_lea.vmem %s1020_s3, %s772_s14 }
  0x31   : > { %416 = vmatpush1.bf16.msra.mxu0 %v816_v14  ;;  %459 = vmatpush1.bf16.msra.mxu1 %v817_v15  ;;  %v824_v20 = vld [vmem:[#allocation2 + $0x64] ss:$16 sps:$4 sm:$0xff]   ;;  %v826_v21 = vld [vmem:[#allocation2 + $0x6c] ss:$16 sps:$4 sm:$0xff]   ;;  %v828_v22 = vld [vmem:[#allocation2 + $0x60] ss:$16 sps:$4 sm:$0xff]  }
  0x32   : > { %v207_v8 = vsel %vm204_vm0, %v205_v3, %v206_v4  ;;  %v209_v9 = vsel %vm204_vm0, %v206_v4, 0.0  ;;  %417 = vmatprep.subr.bf16.mxu0 %v818_v16  ;;  %460 = vmatprep.subr.bf16.mxu1 %v820_v17  ;;  %v829_v23 = vld [vmem:[#allocation2 + $0x68] ss:$16 sps:$4 sm:$0xff]   ;;  %v830_v24 = vld [vmem:[#allocation2 + $0x84] ss:$16 sps:$4 sm:$0xff]  }
  0x33   : > { %v801_v11 = vpack.i.bf16 %v209_v9, %v207_v8  ;;  %v832_v25 = vld [vmem:[#allocation2 + $0x8c] ss:$16 sps:$4 sm:$0xff]   ;;  %v834_v26 = vld [vmem:[#allocation2 + $0x80] ss:$16 sps:$4 sm:$0xff]   ;;  %v835_v27 = vld [vmem:[#allocation2 + $0x88] ss:$16 sps:$4 sm:$0xff]  }
  0x34   : > { %v836_v28 = vld [vmem:[#allocation2 + $0xa4] ss:$16 sps:$4 sm:$0xff]   ;;  %v838_v29 = vld [vmem:[#allocation2 + $0xac] ss:$16 sps:$4 sm:$0xff]   ;;  %v840_v30 = vld [vmem:[#allocation2 + $0xa0] ss:$16 sps:$4 sm:$0xff]  }
  0x35   : > { %802 = vrot.lane.b32.xlu0 %v801_v11, %s898_s7  ;;  %418 = vmatpush1.bf16.msra.mxu0 %v822_v18  ;;  %v841_v31 = vld [vmem:[#allocation2 + $0xa8] ss:$16 sps:$4 sm:$0xff]   ;;  %v842_v32 = vld [vmem:[#allocation2 + $0xc4] ss:$16 sps:$4 sm:$0xff]   ;;  %v844_v33 = vld [vmem:[#allocation2 + $0xcc] ss:$16 sps:$4 sm:$0xff]  }
  0x36   : > { %461 = vmatpush1.bf16.msra.mxu1 %v823_v19  ;;  %419 = vmatprep.subr.bf16.mxu0 %v824_v20  ;;  %v846_v34 = vld [vmem:[#allocation2 + $0xc0] ss:$16 sps:$4 sm:$0xff]   ;;  %v847_v35 = vld [vmem:[#allocation2 + $0xc8] ss:$16 sps:$4 sm:$0xff]   ;;  %v848_v36 = vld [vmem:[#allocation2 + $0xe4] ss:$16 sps:$4 sm:$0xff]  }
  0x37   : > { %462 = vmatprep.subr.bf16.mxu1 %v826_v21  ;;  %v850_v37 = vld [vmem:[#allocation2 + $0xec] ss:$16 sps:$4 sm:$0xff]   ;;  %v852_v38 = vld [vmem:[#allocation2 + $0xe0] ss:$16 sps:$4 sm:$0xff]   ;;  %v853_v39 = vld [vmem:[#allocation2 + $0xe8] ss:$16 sps:$4 sm:$0xff]  }
  0x39   : > { %420 = vmatpush1.bf16.msra.mxu0 %v828_v22 }
  0x3a   : > { %463 = vmatpush1.bf16.msra.mxu1 %v829_v23  ;;  %421 = vmatprep.subr.bf16.mxu0 %v830_v24 }
  0x3b   : > { %464 = vmatprep.subr.bf16.mxu1 %v832_v25 }
  0x3d   : > { %422 = vmatpush1.bf16.msra.mxu0 %v834_v26 }
  0x3e   : > { %465 = vmatpush1.bf16.msra.mxu1 %v835_v27  ;;  %423 = vmatprep.subr.bf16.mxu0 %v836_v28 }
  0x3f   : > { %466 = vmatprep.subr.bf16.mxu1 %v838_v29 }
  0x41   : > { %424 = vmatpush1.bf16.msra.mxu0 %v840_v30 }
  0x42   : > { %467 = vmatpush1.bf16.msra.mxu1 %v841_v31  ;;  %425 = vmatprep.subr.bf16.mxu0 %v842_v32 }
  0x43   : > { %468 = vmatprep.subr.bf16.mxu1 %v844_v33 }
  0x45   : > { %426 = vmatpush1.bf16.msra.mxu0 %v846_v34 }
  0x46   : > { %469 = vmatpush1.bf16.msra.mxu1 %v847_v35  ;;  %427 = vmatprep.subr.bf16.mxu0 %v848_v36 }
  0x47   : > { %470 = vmatprep.subr.bf16.mxu1 %v850_v37 }
  0x49   : > { %428 = vmatpush1.bf16.msra.mxu0 %v852_v38 }
  0x4a   : > { %471 = vmatpush1.bf16.msra.mxu1 %v853_v39 }
  0xa7   : > { %v803_v40 = vpop.permute.xlu0 %802 }
  0xa8   : > { %v805_v41 = vunpack.i.h.bf16 %v803_v40  ;;  %v804_v42 = vunpack.i.l.bf16 %v803_v40 }
  0xaa   : > { %v218_v43 = vsel %vm217_vm1, %v973_v1, %v804_v42  ;;  %v219_v44 = vsel %vm217_vm1, %v975_v2, %v805_v41 }
  0xab   : > { %v220_v45 = vpack.c.bf16 %v219_v44, %v218_v43 }
  0xad   : > { %446 = vmatmul.mubr.bf16.vlgmr.msra.gmra.mrb[0].mxu0 %v220_v45  ;;  %489 = vmatmul.mubr.bf16.vlgmr.msra.gmra.mrb[0].mxu1 %v220_v45 }
 0x180   : > { %v447_v46 = vpop.f32.mrb[0].mxu0  ;;  %v490_v47 = vpop.f32.mrb[0].mxu1 }
 0x181   : > { %v527_v48 = vmul.f32 %v447_v46, %v447_v46  ;;  %v529_v49 = vmul.f32 %v490_v47, %v490_v47  ;;  %v449_v50 = vpop.f32.mrb[1].mxu0  ;;  %v492_v51 = vpop.f32.mrb[1].mxu1 }
 0x182   : > { %v528_v55 = vmul.f32 %v449_v50, %v449_v50  ;;  %v773_v56 = vpack.c.bf16 %v449_v50, %v447_v46  ;;  %v530_v57 = vmul.f32 %v492_v51, %v492_v51  ;;  %v774_v58 = vpack.c.bf16 %v492_v51, %v490_v47  ;;  %v451_v59 = vpop.f32.mrb[2].mxu0  ;;  %v989_v60 = vpop.f32.mrb[2].mxu1 }
 0x183   : > { %v499_v61 = vadd.f32 %v451_v59, %v447_v46  ;;  %v531_v62 = vmul.f32 %v451_v59, %v451_v59  ;;  %v513_v63 = vadd.f32 %v989_v60, %v490_v47  ;;  %v533_v0 = vmul.f32 %v989_v60, %v989_v60  ;;  %v453_v1 = vpop.f32.mrb[3].mxu0  ;;  %v994_v2 = vpop.f32.mrb[3].mxu1 }
 0x184   : > { %615 = vst [vmem:[%s985_s11] sm:$0xff] %v773_v56  ;;  %616 = vst [vmem:[%s985_s11 + $0x8] sm:$0xff] %v774_v58  ;;  %v506_v3 = vadd.f32 %v453_v1, %v449_v50  ;;  %v532_v4 = vmul.f32 %v453_v1, %v453_v1  ;;  %v775_v5 = vpack.c.bf16 %v453_v1, %v451_v59 }
 0x185   : > { %v520_v6 = vadd.f32 %v994_v2, %v492_v51  ;;  %v500_v7 = vrot.slane %v499_v61, 4  ;;  %v535_v8 = vadd.f32 %v531_v62, %v527_v48  ;;  %v514_v9 = vrot.slane %v513_v63, 4 }
 0x186   : > { %v549_v10 = vadd.f32 %v533_v0, %v529_v49  ;;  %v507_v11 = vrot.slane %v506_v3, 4  ;;  %v542_v12 = vadd.f32 %v532_v4, %v528_v55  ;;  %617 = vst [vmem:[%s985_s11 + $0x10] sm:$0xff] %v775_v5  ;;  %v534_v14 = vmul.f32 %v994_v2, %v994_v2 }
 0x187   : > { %v521_v13 = vrot.slane %v520_v6, 4  ;;  %v501_v15 = vadd.f32 %v500_v7, %v499_v61  ;;  %v536_v16 = vrot.slane %v535_v8, 4  ;;  %v515_v17 = vadd.f32 %v514_v9, %v513_v63 }
 0x188   : > { %v550_v18 = vrot.slane %v549_v10, 4  ;;  %v508_v19 = vadd.f32 %v507_v11, %v506_v3  ;;  %v543_v20 = vrot.slane %v542_v12, 4  ;;  %v556_v22 = vadd.f32 %v534_v14, %v530_v57 }
 0x189   : > { %v522_v21 = vadd.f32 %v521_v13, %v520_v6  ;;  %v502_v23 = vrot.slane %v501_v15, 2  ;;  %v537_v24 = vadd.f32 %v536_v16, %v535_v8  ;;  %v516_v25 = vrot.slane %v515_v17, 2 }
 0x18a   : > { %v551_v26 = vadd.f32 %v550_v18, %v549_v10  ;;  %v509_v27 = vrot.slane %v508_v19, 2  ;;  %v544_v28 = vadd.f32 %v543_v20, %v542_v12  ;;  %v557_v30 = vrot.slane %v556_v22, 4 }
 0x18b   : > { %v523_v29 = vrot.slane %v522_v21, 2  ;;  %v503_v31 = vadd.f32 %v502_v23, %v501_v15  ;;  %v538_v32 = vrot.slane %v537_v24, 2  ;;  %v517_v33 = vadd.f32 %v516_v25, %v515_v17 }
 0x18c   : > { %v552_v34 = vrot.slane %v551_v26, 2  ;;  %v510_v35 = vadd.f32 %v509_v27, %v508_v19  ;;  %v545_v36 = vrot.slane %v544_v28, 2  ;;  %v558_v38 = vadd.f32 %v557_v30, %v556_v22 }
 0x18d   : > { %v524_v37 = vadd.f32 %v523_v29, %v522_v21  ;;  %v504_v39 = vrot.slane %v503_v31, 1  ;;  %v539_v40 = vadd.f32 %v538_v32, %v537_v24  ;;  %v518_v41 = vrot.slane %v517_v33, 1 }
 0x18e   : > { %v553_v42 = vadd.f32 %v552_v34, %v551_v26  ;;  %v511_v43 = vrot.slane %v510_v35, 1  ;;  %v546_v44 = vadd.f32 %v545_v36, %v544_v28  ;;  %v559_v45 = vrot.slane %v558_v38, 2 }
 0x18f   : > { %v540_v46 = vrot.slane %v539_v40, 1  ;;  %v576_v48 = vunpack.c.0.s8 %v987_v53  ;;  %v578_v49 = vshrl.u32 %v577_v54, 7  ;;  %v505_v50 = vadd.f32 %v504_v39, %v503_v31 }
 0x190   : > { %v554_v47 = vrot.slane %v553_v42, 1  ;;  %v547_v51 = vrot.slane %v546_v44, 1  ;;  %v525_v52 = vrot.slane %v524_v37, 1  ;;  %v560_v55 = vadd.f32 %v559_v45, %v558_v38 }
 0x191   : > { %v541_v56 = vadd.f32 %v540_v46, %v539_v40  ;;  %v519_v57 = vadd.f32 %v518_v41, %v517_v33  ;;  %v776_v59 = vpack.c.bf16 %v994_v2, %v989_v60  ;;  %v512_v61 = vadd.f32 %v511_v43, %v510_v35 }
 0x192   : > { %v555_v58 = vadd.f32 %v554_v47, %v553_v42  ;;  %v548_v62 = vadd.f32 %v547_v51, %v546_v44  ;;  %v561_v63 = vrot.slane %v560_v55, 1  ;;  %v579_v1 = vsub.s32 %v576_v48, %v578_v49 }
 0x193   : > { %v564_v0 = vsel %vm563_vm2, %v505_v50, %v541_v56  ;;  %618 = vst [vmem:[%s985_s11 + $0x18] sm:$0xff] %v776_v59  ;;  %v526_v3 = vadd.f32 %v525_v52, %v524_v37 }
 0x194   : > { %v566_v53 = vsel %vm563_vm2, %v519_v57, %v555_v58  ;;  %v565_v54 = vsel %vm563_vm2, %v512_v61, %v548_v62  ;;  %v562_v4 = vadd.f32 %v561_v63, %v560_v55 }
 0x195   : > { %v572_v5 = vcombine.low %v564_v0, %v565_v54 }
 0x196   : > { %v567_v6 = vsel %vm563_vm2, %v526_v3, %v562_v4 }
 0x197   : > { %v580_v7 = vrot.slane %v572_v5, %v579_v1  ;;  %v573_v8 = vcombine.low %v566_v53, %v567_v6 }
 0x199   : > { %v587_v60 = vrot.slane %v573_v8, %v579_v1 }
 0x19b   : > { %v588_v2 = vcombine.low %v580_v7, %v587_v60 }
 0x19d   : > { %590 = vst [vmem:[%s198_s17] sm:$0xff] %v588_v2 }
 0x19e PF: > { %s15_s12 = sadd.s32 1, %s892_s12  }
 0x19f   : > { %p12_p3 = scmp.ge.s32.totalorder %s15_s12, 4  }
 0x1a1   :  { %14 = sbr.rel (!%p12_p3) target bundleno = 1 (0x1), region = 75 }
 0x1a8   :  { %656 = vsyncpa [#allocation3], 1 }
 0x1a9   :  { %658 = vsyncpa [#allocation3 + $0x1], 1 }

// kernel: decoder_block_forward.7
= control target key start
LH: loop header
LB: loop body
LE: loop exit
PB: predicated region body
PF: predicated region fallthrough
CT: control target
= control target key end

     0   :  { %s343_s12 = smov 0   ;;  %s370_s0 = inlined_call_operand.vmem [shape: bf16[2,32,256], index: 0, kind: input, shape index: {}]   ;;  %s371_s1 = inlined_call_operand.vmem [shape: f32[1,256], index: 1, kind: input, shape index: {}]   ;;  %s372_s2 = inlined_call_operand.vmem [shape: f32[1,256], index: 2, kind: input, shape index: {}]   ;;  %s373_s3 = inlined_call_operand.vmem [shape: f32[2,32,256], index: 3, kind: output, shape index: {}]  }
   0x1 LB: > { %s294_s13 = sadd.s32 4294967295, %s321_s12   ;;  %p298_p0 = scmp.ge.s32.totalorder %s321_s12, 1  ;;  %s321_s12 = sphi %s343_s12, %s13_s12  }
   0x2   : > { %p137_p1 = scmp.lt.s32.totalorder %s321_s12, 3 }
   0x4   : > { %p138_p2 = pnand %p298_p0, %p137_p1 }
   0x5   : > { %p161_p3 = scmp.lt.s32.totalorder (!%p138_p2), %s294_s13, 1  ;;  %v185_v0 = vlaneseq (!%p138_p2)  ;;  %v183_v2 = vld [vmem:[%s371_s1] sm:$0x3] (!%p138_p2) }
   0x6   : > { %141 = sbr.rel (%p138_p2) target bundleno = 29 (0x1d), region = 32  ;;  %v203_v3 = vld [vmem:[%s372_s2] sm:$0x3] (!%p138_p2) }
   0x7   : > { %v186_v1 = vshrl.u32 (!%p138_p2), %v185_v0, 7 }
   0x9   : > { %v187_v4 = vsub.s32 (!%p138_p2), 0, %v186_v1  ;;  %v191_v5 = vsub.s32 (!%p138_p2), 1, %v186_v1 }
   0xb   : > { %v188_v7 = vrot.slane (!%p138_p2), %v183_v2, %v187_v4  ;;  %v208_v8 = vrot.slane (!%p138_p2), %v203_v3, %v187_v4  ;;  %v192_v9 = vrot.slane (!%p138_p2), %v183_v2, %v191_v5  ;;  %v212_v10 = vrot.slane (!%p138_p2), %v203_v3, %v191_v5 }
   0xd   : > { %s375_s13 = smov (!%p161_p3, %s294_s13), 1 }
   0xe   : > { %s305_s18 = sshll.u32 %s375_s13, 5  ;;  %s306_s22 = sshll.u32 %s375_s13, 6 }
   0xf   : > { %s165_s21 = scalar_lea.vmem %s370_s0, %s305_s18  ;;  %s170_s25 = scalar_lea.vmem %s373_s3, %s306_s22 }
  0x10   : > { %v171_v6 = vld [vmem:[%s165_s21] sm:$0xff]  ;;  %v172_v11 = vld [vmem:[%s165_s21 + $0x8] sm:$0xff]  ;;  %v173_v12 = vld [vmem:[%s165_s21 + $0x10] sm:$0xff] }
  0x11   : > { %v175_v13 = vunpack.c.l.bf16 %v171_v6  ;;  %v176_v14 = vunpack.c.h.bf16 %v171_v6  ;;  %v177_v15 = vunpack.c.l.bf16 %v172_v11  ;;  %v178_v16 = vunpack.c.h.bf16 %v172_v11  ;;  %v174_v17 = vld [vmem:[%s165_s21 + $0x18] sm:$0xff] }
  0x12   : > { %v179_v18 = vunpack.c.l.bf16 %v173_v12  ;;  %v180_v19 = vunpack.c.h.bf16 %v173_v12  ;;  %v181_v20 = vunpack.c.l.bf16 %v174_v17  ;;  %v182_v21 = vunpack.c.h.bf16 %v174_v17 }
  0x13   : > { %v195_v22 = vmul.f32 %v188_v7, %v175_v13  ;;  %v196_v23 = vmul.f32 %v192_v9, %v176_v14  ;;  %v197_v24 = vmul.f32 %v188_v7, %v177_v15  ;;  %v198_v25 = vmul.f32 %v192_v9, %v178_v16 }
  0x14   : > { %v199_v26 = vmul.f32 %v188_v7, %v179_v18  ;;  %v200_v27 = vmul.f32 %v192_v9, %v180_v19  ;;  %v201_v28 = vmul.f32 %v188_v7, %v181_v20  ;;  %v202_v29 = vmul.f32 %v192_v9, %v182_v21 }
  0x15   : > { %v215_v30 = vadd.f32 %v208_v8, %v195_v22  ;;  %v216_v31 = vadd.f32 %v212_v10, %v196_v23  ;;  %v217_v32 = vadd.f32 %v208_v8, %v197_v24  ;;  %v218_v33 = vadd.f32 %v212_v10, %v198_v25 }
  0x16   : > { %v219_v34 = vadd.f32 %v208_v8, %v199_v26  ;;  %v220_v35 = vadd.f32 %v212_v10, %v200_v27  ;;  %v221_v36 = vadd.f32 %v208_v8, %v201_v28  ;;  %v222_v37 = vadd.f32 %v212_v10, %v202_v29 }
  0x17   : > { %v223_v38 = vmax.f32 %v215_v30, 0.0  ;;  %v224_v39 = vmax.f32 %v216_v31, 0.0  ;;  %v225_v40 = vmax.f32 %v217_v32, 0.0  ;;  %v226_v41 = vmax.f32 %v218_v33, 0.0 }
  0x18   : > { %v227_v42 = vmax.f32 %v219_v34, 0.0  ;;  %v228_v43 = vmax.f32 %v220_v35, 0.0  ;;  %v229_v44 = vmax.f32 %v221_v36, 0.0  ;;  %v230_v45 = vmax.f32 %v222_v37, 0.0 }
  0x19   : > { %231 = vst [vmem:[%s170_s25] sm:$0xff] %v223_v38  ;;  %232 = vst [vmem:[%s170_s25 + $0x8] sm:$0xff] %v224_v39 }
  0x1a   : > { %233 = vst [vmem:[%s170_s25 + $0x10] sm:$0xff] %v225_v40  ;;  %234 = vst [vmem:[%s170_s25 + $0x18] sm:$0xff] %v226_v41 }
  0x1b   : > { %235 = vst [vmem:[%s170_s25 + $0x20] sm:$0xff] %v227_v42  ;;  %236 = vst [vmem:[%s170_s25 + $0x28] sm:$0xff] %v228_v43 }
  0x1c   : > { %237 = vst [vmem:[%s170_s25 + $0x30] sm:$0xff] %v229_v44  ;;  %238 = vst [vmem:[%s170_s25 + $0x38] sm:$0xff] %v230_v45 }
  0x1d PF: > { %s13_s12 = sadd.s32 1, %s321_s12  }
  0x1e   : > { %p10_p4 = scmp.ge.s32.totalorder %s13_s12, 4  }
  0x20   :  { %12 = sbr.rel (!%p10_p4) target bundleno = 1 (0x1), region = 62 }

// kernel: decoder_block_forward.5
= control target key start
LH: loop header
LB: loop body
LE: loop exit
PB: predicated region body
PF: predicated region fallthrough
CT: control target
= control target key end

     0   :  { %s1652_s18 = smov 0   ;;  %s2098_s0 = inlined_call_operand.vmem [shape: bf16[2,32,256], index: 0, kind: input, shape index: {}]   ;;  %s2099_s1 = inlined_call_operand.vmem [shape: f32[1,256], index: 1, kind: input, shape index: {}]   ;;  %s2100_s2 = inlined_call_operand.vmem [shape: f32[1,256], index: 2, kind: input, shape index: {}]   ;;  %s2101_s3 = inlined_call_operand.vmem [shape: bf16[768,256], index: 3, kind: input, shape index: {}]   ;;  %s2102_s4 = inlined_call_operand.vmem [shape: bf16[2,32,256], index: 4, kind: output, shape index: {0}]   ;;  %s2103_s5 = inlined_call_operand.vmem [shape: f32[2,2,256], index: 5, kind: output, shape index: {1}]  }
   0x1 LB: > { %s1277_s19 = sadd.s32 4294967295, %s1619_s18   ;;  %p1281_p0 = scmp.ge.s32.totalorder %s1619_s18, 1  ;;  %s1619_s18 = sphi %s1652_s18, %s16_s18  }
   0x2   : > { %p190_p1 = scmp.lt.s32.totalorder %s1619_s18, 3 }
   0x4   : > { %p191_p2 = pnand %p1281_p0, %p190_p1 }
   0x5   : > { %v1469_v0 = vld [vmem:[%s2101_s3 + $0x4] ss:$8 sps:$4 sm:$0xff] (!%p191_p2)   ;;  %v1473_v2 = vld [vmem:[%s2101_s3] ss:$8 sps:$4 sm:$0xff] (!%p191_p2)   ;;  %v1475_v4 = vld [vmem:[%s2101_s3 + $0x14] ss:$8 sps:$4 sm:$0xff] (!%p191_p2)   ;;  %v252_v36 = vlaneseq (!%p191_p2) }
   0x6   : > { %194 = sbr.rel (%p191_p2) target bundleno = 376 (0x178), region = 36  ;;  %v1471_v1 = vld [vmem:[%s2101_s3 + $0x104] ss:$8 sps:$4 sm:$0xff] (!%p191_p2)   ;;  %944 = vmatprep.subr.bf16.mxu1 (!%p191_p2), %v1469_v0  ;;  %v1474_v3 = vld [vmem:[%s2101_s3 + $0x100] ss:$8 sps:$4 sm:$0xff] (!%p191_p2)   ;;  %p223_p3 = scmp.lt.s32.totalorder (!%p191_p2), %s1277_s19, 1 }
   0x7   : > { %997 = vmatprep.subr.bf16.mxu0 (!%p191_p2), %v1471_v1  ;;  %945 = vmatpush1.bf16.msra.mxu1 (!%p191_p2), %v1473_v2  ;;  %v1477_v5 = vld [vmem:[%s2101_s3 + $0x114] ss:$8 sps:$4 sm:$0xff] (!%p191_p2)   ;;  %v1479_v6 = vld [vmem:[%s2101_s3 + $0x10] ss:$8 sps:$4 sm:$0xff] (!%p191_p2)   ;;  %v1481_v8 = vld [vmem:[%s2101_s3 + $0x24] ss:$8 sps:$4 sm:$0xff] (!%p191_p2)  }
   0x8   : > { %998 = vmatpush1.bf16.msra.mxu0 (!%p191_p2), %v1474_v3  ;;  %946 = vmatprep.subr.bf16.mxu1 (!%p191_p2), %v1475_v4  ;;  %v1480_v7 = vld [vmem:[%s2101_s3 + $0x110] ss:$8 sps:$4 sm:$0xff] (!%p191_p2)   ;;  %v1483_v9 = vld [vmem:[%s2101_s3 + $0x124] ss:$8 sps:$4 sm:$0xff] (!%p191_p2)   ;;  %v1485_v10 = vld [vmem:[%s2101_s3 + $0x20] ss:$8 sps:$4 sm:$0xff] (!%p191_p2)  }
   0x9   : > { %999 = vmatprep.subr.bf16.mxu0 (!%p191_p2), %v1477_v5  ;;  %v1486_v11 = vld [vmem:[%s2101_s3 + $0x120] ss:$8 sps:$4 sm:$0xff] (!%p191_p2)   ;;  %v1487_v12 = vld [vmem:[%s2101_s3 + $0x34] ss:$8 sps:$4 sm:$0xff] (!%p191_p2)   ;;  %v1491_v14 = vld [vmem:[%s2101_s3 + $0x30] ss:$8 sps:$4 sm:$0xff] (!%p191_p2)  }
   0xa   : > { %v1489_v13 = vld [vmem:[%s2101_s3 + $0x134] ss:$8 sps:$4 sm:$0xff] (!%p191_p2)   ;;  %v1492_v15 = vld [vmem:[%s2101_s3 + $0x130] ss:$8 sps:$4 sm:$0xff] (!%p191_p2)   ;;  %v1493_v16 = vld [vmem:[%s2101_s3 + $0x44] ss:$8 sps:$4 sm:$0xff] (!%p191_p2)  }
   0xb   : > { %947 = vmatpush1.bf16.msra.mxu1 (!%p191_p2), %v1479_v6  ;;  %v1495_v17 = vld [vmem:[%s2101_s3 + $0x144] ss:$8 sps:$4 sm:$0xff] (!%p191_p2)   ;;  %v1497_v18 = vld [vmem:[%s2101_s3 + $0x40] ss:$8 sps:$4 sm:$0xff] (!%p191_p2)   ;;  %v1499_v20 = vld [vmem:[%s2101_s3 + $0x54] ss:$8 sps:$4 sm:$0xff] (!%p191_p2)  }
   0xc   : > { %1000 = vmatpush1.bf16.msra.mxu0 (!%p191_p2), %v1480_v7  ;;  %948 = vmatprep.subr.bf16.mxu1 (!%p191_p2), %v1481_v8  ;;  %v1498_v19 = vld [vmem:[%s2101_s3 + $0x140] ss:$8 sps:$4 sm:$0xff] (!%p191_p2)   ;;  %v1501_v21 = vld [vmem:[%s2101_s3 + $0x154] ss:$8 sps:$4 sm:$0xff] (!%p191_p2)   ;;  %v1503_v22 = vld [vmem:[%s2101_s3 + $0x50] ss:$8 sps:$4 sm:$0xff] (!%p191_p2)  }
   0xd   : > { %1001 = vmatprep.subr.bf16.mxu0 %v1483_v9  ;;  %v1504_v23 = vld [vmem:[%s2101_s3 + $0x150] ss:$8 sps:$4 sm:$0xff]   ;;  %v1505_v24 = vld [vmem:[%s2101_s3 + $0x64] ss:$8 sps:$4 sm:$0xff]   ;;  %v1509_v26 = vld [vmem:[%s2101_s3 + $0x60] ss:$8 sps:$4 sm:$0xff]  }
   0xe   : > { %v1507_v25 = vld [vmem:[%s2101_s3 + $0x164] ss:$8 sps:$4 sm:$0xff]   ;;  %v1510_v27 = vld [vmem:[%s2101_s3 + $0x160] ss:$8 sps:$4 sm:$0xff]   ;;  %v1511_v28 = vld [vmem:[%s2101_s3 + $0x74] ss:$8 sps:$4 sm:$0xff]  }
   0xf   : > { %949 = vmatpush1.bf16.msra.mxu1 %v1485_v10  ;;  %v1513_v29 = vld [vmem:[%s2101_s3 + $0x174] ss:$8 sps:$4 sm:$0xff]   ;;  %v1515_v30 = vld [vmem:[%s2101_s3 + $0x70] ss:$8 sps:$4 sm:$0xff]   ;;  %v1517_v32 = vld [vmem:[%s2101_s3 + $0x84] ss:$8 sps:$4 sm:$0xff]  }
  0x10   : > { %1002 = vmatpush1.bf16.msra.mxu0 %v1486_v11  ;;  %950 = vmatprep.subr.bf16.mxu1 %v1487_v12  ;;  %v1516_v31 = vld [vmem:[%s2101_s3 + $0x170] ss:$8 sps:$4 sm:$0xff]   ;;  %v1519_v33 = vld [vmem:[%s2101_s3 + $0x184] ss:$8 sps:$4 sm:$0xff]   ;;  %v1521_v34 = vld [vmem:[%s2101_s3 + $0x80] ss:$8 sps:$4 sm:$0xff]  }
  0x11   : > { %1003 = vmatprep.subr.bf16.mxu0 %v1489_v13  ;;  %v1522_v35 = vld [vmem:[%s2101_s3 + $0x180] ss:$8 sps:$4 sm:$0xff]   ;;  %v1523_v37 = vld [vmem:[%s2101_s3 + $0x94] ss:$8 sps:$4 sm:$0xff]   ;;  %s2111_s19 = smov (!%p223_p3, %s1277_s19), 1  ;;  %v253_v40 = vshrl.u32 %v252_v36, 7 }
  0x12   : > { %v1525_v38 = vld [vmem:[%s2101_s3 + $0x194] ss:$8 sps:$4 sm:$0xff]   ;;  %v1527_v39 = vld [vmem:[%s2101_s3 + $0x90] ss:$8 sps:$4 sm:$0xff]   ;;  %v1529_v42 = vld [vmem:[%s2101_s3 + $0xa4] ss:$8 sps:$4 sm:$0xff]  }
  0x13   : > { %951 = vmatpush1.bf16.msra.mxu1 %v1491_v14  ;;  %v1528_v41 = vld [vmem:[%s2101_s3 + $0x190] ss:$8 sps:$4 sm:$0xff]   ;;  %s1405_s8 = sshll.u32 %s2111_s19, 5  ;;  %v1531_v43 = vld [vmem:[%s2101_s3 + $0x1a4] ss:$8 sps:$4 sm:$0xff]   ;;  %v254_v47 = vsub.s32 0, %v253_v40 }
  0x14   : > { %1004 = vmatpush1.bf16.msra.mxu0 %v1492_v15  ;;  %952 = vmatprep.subr.bf16.mxu1 %v1493_v16  ;;  %v1533_v44 = vld [vmem:[%s2101_s3 + $0xa0] ss:$8 sps:$4 sm:$0xff]   ;;  %s1804_s17 = scalar_lea.vmem %s2098_s0, %s1405_s8  ;;  %v1535_v46 = vld [vmem:[%s2101_s3 + $0xb4] ss:$8 sps:$4 sm:$0xff]   ;;  %v258_v48 = vsub.s32 1, %v253_v40  ;;  %vm306_vm0 = vcmask 1040384   ;;  %s232_s22 = scalar_lea.vmem %s2102_s4, %s1405_s8 }
  0x15   : > { %1005 = vmatprep.subr.bf16.mxu0 %v1495_v17  ;;  %v1534_v45 = vld [vmem:[%s2101_s3 + $0x1a0] ss:$8 sps:$4 sm:$0xff]   ;;  %v1537_v49 = vld [vmem:[%s2101_s3 + $0x1b4] ss:$8 sps:$4 sm:$0xff]   ;;  %v1539_v50 = vld [vmem:[%s2101_s3 + $0xb0] ss:$8 sps:$4 sm:$0xff]  }
  0x16   : > { %v238_v51 = vld [vmem:[%s1804_s17] sm:$0xff]  ;;  %v239_v52 = vld [vmem:[%s1804_s17 + $0x8] sm:$0xff]  ;;  %v1540_v57 = vld [vmem:[%s2101_s3 + $0x1b0] ss:$8 sps:$4 sm:$0xff]   ;;  %vm331_vm2 = vcmask 1046528   ;;  %vm1621_vm3 = vmmov 1  }
  0x17   : > { %953 = vmatpush1.bf16.msra.mxu1 %v1497_v18  ;;  %v242_v53 = vunpack.c.l.bf16 %v238_v51  ;;  %v243_v54 = vunpack.c.h.bf16 %v238_v51  ;;  %v250_v55 = vld [vmem:[%s2099_s1] sm:$0x3]  ;;  %v244_v58 = vunpack.c.l.bf16 %v239_v52  ;;  %v245_v59 = vunpack.c.h.bf16 %v239_v52  ;;  %v1541_v62 = vld [vmem:[%s2101_s3 + $0xc4] ss:$8 sps:$4 sm:$0xff]   ;;  %v1547_v8 = vld [vmem:[%s2101_s3 + $0xd4] ss:$8 sps:$4 sm:$0xff]  }
  0x18   : > { %1006 = vmatpush1.bf16.msra.mxu0 %v1498_v19  ;;  %954 = vmatprep.subr.bf16.mxu1 %v1499_v20  ;;  %v270_v56 = vld [vmem:[%s2100_s2] sm:$0x3]  ;;  %v1826_v60 = vrot.slane %v250_v55, %v254_v47  ;;  %v1828_v61 = vrot.slane %v250_v55, %v258_v48  ;;  %v1543_v63 = vld [vmem:[%s2101_s3 + $0x1c4] ss:$8 sps:$4 sm:$0xff]   ;;  %v1549_v12 = vld [vmem:[%s2101_s3 + $0x1d4] ss:$8 sps:$4 sm:$0xff]  }
  0x19   : > { %1007 = vmatprep.subr.bf16.mxu0 %v1501_v21  ;;  %v1836_v0 = vrot.slane %v270_v56, %v254_v47  ;;  %v1838_v1 = vrot.slane %v270_v56, %v258_v48  ;;  %v1545_v6 = vld [vmem:[%s2101_s3 + $0xc0] ss:$8 sps:$4 sm:$0xff]   ;;  %v1551_v14 = vld [vmem:[%s2101_s3 + $0xd0] ss:$8 sps:$4 sm:$0xff]   ;;  %vm1871_vm1 = vmneg %vm306_vm0  ;;  %s1407_s8 = sshll.u32 %s2111_s19, 2 }
  0x1a   : > { %v263_v2 = vmul.f32 %v1828_v61, %v243_v54  ;;  %v265_v3 = vmul.f32 %v1828_v61, %v245_v59  ;;  %v262_v4 = vmul.f32 %v1826_v60, %v242_v53  ;;  %v264_v5 = vmul.f32 %v1826_v60, %v244_v58  ;;  %v1546_v7 = vld [vmem:[%s2101_s3 + $0x1c0] ss:$8 sps:$4 sm:$0xff]   ;;  %v1552_v17 = vld [vmem:[%s2101_s3 + $0x1d0] ss:$8 sps:$4 sm:$0xff]   ;;  %vm1902_vm4 = vmpackc.low %vm1621_vm3, %vm1871_vm1  ;;  %s237_s25 = scalar_lea.vmem %s2103_s5, %s1407_s8 }
  0x1b   : > { %955 = vmatpush1.bf16.msra.mxu1 %v1503_v22  ;;  %v1561_v36 = vld [vmem:[%s2101_s3 + $0x1f4] ss:$8 sps:$4 sm:$0xff]   ;;  %v1565_v48 = vld [vmem:[%s2101_s3 + $0x200] ss:$8 sps:$4 sm:$0xff]   ;;  %v1568_v58 = vld [vmem:[%s2101_s3 + $0x210] ss:$8 sps:$4 sm:$0xff]  }
  0x1c   : > { %1008 = vmatpush1.bf16.msra.mxu0 %v1504_v23  ;;  %956 = vmatprep.subr.bf16.mxu1 %v1505_v24  ;;  %v283_v9 = vadd.f32 %v1838_v1, %v263_v2  ;;  %v285_v10 = vadd.f32 %v1838_v1, %v265_v3  ;;  %v282_v11 = vadd.f32 %v1836_v0, %v262_v4  ;;  %v1553_v24 = vld [vmem:[%s2101_s3 + $0xe4] ss:$8 sps:$4 sm:$0xff]   ;;  %v1570_v51 = vld [vmem:[%s2101_s3 + $0x214] ss:$8 sps:$4 sm:$0xff]   ;;  %vm2000_vm5 = vmpackc.low %vm331_vm2, %vm1621_vm3 }
  0x1d   : > { %1009 = vmatprep.subr.bf16.mxu0 %v1507_v25  ;;  %v284_v13 = vadd.f32 %v1836_v0, %v264_v5  ;;  %v1555_v25 = vld [vmem:[%s2101_s3 + $0x1e4] ss:$8 sps:$4 sm:$0xff]  }
  0x1e   : > { %v1863_v15 = vmax.f32 %v283_v9, 0.0  ;;  %v1865_v16 = vmax.f32 %v285_v10, 0.0  ;;  %v290_v19 = vmax.f32 %v282_v11, 0.0 }
  0x1f   : > { %957 = vmatpush1.bf16.msra.mxu1 %v1509_v26  ;;  %v1879_v23 = vmax.f32 %v284_v13, 0.0  ;;  %v1557_v26 = vld [vmem:[%s2101_s3 + $0xe0] ss:$8 sps:$4 sm:$0xff]   ;;  %v1576_v13 = vld [vmem:[%s2101_s3 + $0x234] ss:$8 sps:$4 sm:$0xff]  }
  0x20   : > { %1010 = vmatpush1.bf16.msra.mxu0 %v1510_v27  ;;  %958 = vmatprep.subr.bf16.mxu1 %v1511_v28  ;;  %v308_v20 = vrot.slane %v1863_v15, 7  ;;  %v311_v21 = vrot.slane %v1865_v16, 7  ;;  %v359_v22 = vpack.c.bf16 %v1865_v16, %v1863_v15  ;;  %v1558_v27 = vld [vmem:[%s2101_s3 + $0x1e0] ss:$8 sps:$4 sm:$0xff]  }
  0x21   : > { %1011 = vmatprep.subr.bf16.mxu0 %v1513_v29  ;;  %v1559_v29 = vld [vmem:[%s2101_s3 + $0xf4] ss:$8 sps:$4 sm:$0xff]  }
  0x22   : > { %v312_v28 = vsel %vm306_vm0, %v308_v20, %v311_v21  ;;  %1029 = vmatprep.mubr.bf16.mxu0 %v359_v22 }
  0x23   : > { %959 = vmatpush1.bf16.msra.mxu1 %v1515_v30 }
  0x24   : > { %1012 = vmatpush1.bf16.msra.mxu0 %v1516_v31  ;;  %960 = vmatprep.subr.bf16.mxu1 %v1517_v32  ;;  %v1386_v31 = vpack.c.bf16 %v312_v28, %v308_v20  ;;  %v307_v32 = vrot.slane %v290_v19, 7 }
  0x25   : > { %1013 = vmatprep.subr.bf16.mxu0 %v1519_v33  ;;  %v309_v33 = vrot.slane %v1879_v23, 7 }
  0x26   : > { %1387 = vmatprep.mubr.msk.bf16.mxu1 %vm1902_vm4, %v1386_v31  ;;  %v1577_v31 = vld [vmem:[%s2101_s3 + $0x240] ss:$8 sps:$4 sm:$0xff]  }
  0x27   : > { %961 = vmatpush1.bf16.msra.mxu1 %v1521_v34  ;;  %v332_v34 = vrot.slane %v290_v19, 1  ;;  %v310_v40 = vsel %vm306_vm0, %v307_v32, %v309_v33 }
  0x28   : > { %1014 = vmatpush1.bf16.msra.mxu0 %v1522_v35  ;;  %962 = vmatprep.subr.bf16.mxu1 %v1523_v37  ;;  %v333_v35 = vrot.slane %v1879_v23, 1 }
  0x29   : > { %1015 = vmatprep.subr.bf16.mxu0 %v1525_v38  ;;  %v1563_v38 = vld [vmem:[%s2101_s3 + $0xf0] ss:$8 sps:$4 sm:$0xff]  }
  0x2a   : > { %v1916_v37 = vsel %vm331_vm2, %v332_v34, %v333_v35  ;;  %v1585_v34 = vld [vmem:[%s2101_s3 + $0x264] ss:$8 sps:$4 sm:$0xff]  }
  0x2b   : > { %963 = vmatpush1.bf16.msra.mxu1 %v1527_v39  ;;  %v1564_v39 = vld [vmem:[%s2101_s3 + $0x1f0] ss:$8 sps:$4 sm:$0xff]  }
  0x2c   : > { %1016 = vmatpush1.bf16.msra.mxu0 %v1528_v41  ;;  %964 = vmatprep.subr.bf16.mxu1 %v1529_v42  ;;  %v1567_v41 = vld [vmem:[%s2101_s3 + $0x204] ss:$8 sps:$4 sm:$0xff]   ;;  %v240_v42 = vld [vmem:[%s1804_s17 + $0x10] sm:$0xff] }
  0x2d   : > { %1017 = vmatprep.subr.bf16.mxu0 %v1531_v43  ;;  %v1390_v43 = vpack.c.bf16 %v310_v40, %v307_v32  ;;  %v246_v47 = vunpack.c.l.bf16 %v240_v42  ;;  %v1582_v32 = vld [vmem:[%s2101_s3 + $0x254] ss:$8 sps:$4 sm:$0xff]   ;;  %v1589_v40 = vld [vmem:[%s2101_s3 + $0x280] ss:$8 sps:$4 sm:$0xff]  }
  0x2f   : > { %965 = vmatpush1.bf16.msra.mxu1 %v1533_v44  ;;  %v358_v44 = vpack.c.bf16 %v1879_v23, %v290_v19  ;;  %v266_v53 = vmul.f32 %v1826_v60, %v246_v47  ;;  %v1579_v23 = vld [vmem:[%s2101_s3 + $0x244] ss:$8 sps:$4 sm:$0xff]  }
  0x30   : > { %1018 = vmatpush1.bf16.msra.mxu0 %v1534_v45  ;;  %966 = vmatprep.subr.bf16.mxu1 %v1535_v46  ;;  %v241_v45 = vld [vmem:[%s1804_s17 + $0x18] sm:$0xff]  ;;  %v247_v46 = vunpack.c.h.bf16 %v240_v42  ;;  %v1603_v47 = vld [vmem:[%s2101_s3 + $0x2c4] ss:$8 sps:$4 sm:$0xff]  }
  0x31   : > { %1019 = vmatprep.subr.bf16.mxu0 %v1537_v49  ;;  %v249_v49 = vunpack.c.h.bf16 %v241_v45  ;;  %v1592_v42 = vld [vmem:[%s2101_s3 + $0x290] ss:$8 sps:$4 sm:$0xff]  }
  0x32   : > { %v267_v52 = vmul.f32 %v1828_v61, %v247_v46  ;;  %v1598_v46 = vld [vmem:[%s2101_s3 + $0x2b0] ss:$8 sps:$4 sm:$0xff]  }
  0x33   : > { %967 = vmatpush1.bf16.msra.mxu1 %v1539_v50  ;;  %v248_v50 = vunpack.c.l.bf16 %v241_v45  ;;  %v269_v54 = vmul.f32 %v1828_v61, %v249_v49  ;;  %v1600_v45 = vld [vmem:[%s2101_s3 + $0x2b4] ss:$8 sps:$4 sm:$0xff]  }
  0x34   : > { %1020 = vmatpush1.bf16.msra.mxu0 %v1540_v57  ;;  %968 = vmatprep.subr.bf16.mxu1 %v1541_v62  ;;  %v287_v56 = vadd.f32 %v1838_v1, %v267_v52  ;;  %v286_v57 = vadd.f32 %v1836_v0, %v266_v53  ;;  %v336_v62 = vrot.slane %v1865_v16, 1  ;;  %v1606_v49 = vld [vmem:[%s2101_s3 + $0x2d4] ss:$8 sps:$4 sm:$0xff]   ;;  %v1607_v53 = vld [vmem:[%s2101_s3 + $0x2e0] ss:$8 sps:$4 sm:$0xff]  }
  0x35   : > { %1021 = vmatprep.subr.bf16.mxu0 %v1543_v63  ;;  %v268_v55 = vmul.f32 %v1826_v60, %v248_v50  ;;  %v289_v59 = vadd.f32 %v1838_v1, %v269_v54  ;;  %v335_v60 = vrot.slane %v1863_v15, 1  ;;  %v1573_v63 = vld [vmem:[%s2101_s3 + $0x224] ss:$8 sps:$4 sm:$0xff]   ;;  %v1604_v50 = vld [vmem:[%s2101_s3 + $0x2d0] ss:$8 sps:$4 sm:$0xff]  }
  0x36   : > { %v295_v2 = vmax.f32 %v287_v56, 0.0  ;;  %v1957_v3 = vmax.f32 %v286_v57, 0.0  ;;  %v1612_v54 = vld [vmem:[%s2101_s3 + $0x2f4] ss:$8 sps:$4 sm:$0xff]  }
  0x37   : > { %969 = vmatpush1.bf16.msra.mxu1 %v1545_v6  ;;  %v288_v61 = vadd.f32 %v1836_v0, %v268_v55  ;;  %v297_v4 = vmax.f32 %v289_v59, 0.0  ;;  %v1610_v55 = vld [vmem:[%s2101_s3 + $0x2f0] ss:$8 sps:$4 sm:$0xff]  }
  0x38   : > { %1022 = vmatpush1.bf16.msra.mxu0 %v1546_v7  ;;  %970 = vmatprep.subr.bf16.mxu1 %v1547_v8  ;;  %v315_v6 = vrot.slane %v295_v2, 7  ;;  %v313_v1 = vrot.slane %v1957_v3, 7  ;;  %v340_v0 = vrot.slane %v295_v2, 1  ;;  %v338_v7 = vrot.slane %v1957_v3, 1  ;;  %v1571_v8 = vld [vmem:[%s2101_s3 + $0x220] ss:$8 sps:$4 sm:$0xff]  }
  0x39   : > { %1023 = vmatprep.subr.bf16.mxu0 %v1549_v12  ;;  %v1959_v5 = vmax.f32 %v288_v61, 0.0  ;;  %v319_v9 = vrot.slane %v297_v4, 7  ;;  %v365_v10 = vpack.c.bf16 %v297_v4, %v295_v2  ;;  %v337_v12 = vsel %vm331_vm2, %v335_v60, %v336_v62 }
  0x3a   : > { %v314_v15 = vsel %vm306_vm0, %v309_v33, %v313_v1  ;;  %v344_v18 = vrot.slane %v297_v4, 1  ;;  %v341_v22 = vsel %vm331_vm2, %v336_v62, %v340_v0  ;;  %v1987_v16 = vsel %vm331_vm2, %v333_v35, %v338_v7  ;;  %v1580_v33 = vld [vmem:[%s2101_s3 + $0x250] ss:$8 sps:$4 sm:$0xff]   ;;  %v1583_v35 = vld [vmem:[%s2101_s3 + $0x260] ss:$8 sps:$4 sm:$0xff]  }
  0x3b   : > { %971 = vmatpush1.bf16.msra.mxu1 %v1551_v14  ;;  %v317_v11 = vrot.slane %v1959_v5, 7  ;;  %v316_v14 = vsel %vm306_vm0, %v311_v21, %v315_v6  ;;  %v320_v19 = vsel %vm306_vm0, %v315_v6, %v319_v9  ;;  %v360_v28 = vpack.c.bf16 %v1987_v16, %v1916_v37 }
  0x3c   : > { %1024 = vmatpush1.bf16.msra.mxu0 %v1552_v17  ;;  %972 = vmatprep.subr.bf16.mxu1 %v1553_v24  ;;  %v364_v17 = vpack.c.bf16 %v1959_v5, %v1957_v3  ;;  %v363_v21 = vpack.c.bf16 %v320_v19, %v316_v14  ;;  %v342_v52 = vrot.slane %v1959_v5, 1 }
  0x3d   : > { %1025 = vmatprep.subr.bf16.mxu0 %v1555_v25  ;;  %v318_v20 = vsel %vm306_vm0, %v313_v1, %v317_v11  ;;  %v361_v25 = vpack.c.bf16 %v341_v22, %v337_v12 }
  0x3e   : > { %v362_v24 = vpack.c.bf16 %v318_v20, %v314_v15  ;;  %v343_v56 = vsel %vm331_vm2, %v338_v7, %v342_v52 }
  0x3f   : > { %973 = vmatpush1.bf16.msra.mxu1 %v1557_v26  ;;  %v345_v26 = vsel %vm331_vm2, %v340_v0, %v344_v18  ;;  %v1396_v57 = vpack.c.bf16 %v342_v52, %v343_v56 }
  0x40   : > { %1026 = vmatpush1.bf16.msra.mxu0 %v1558_v27  ;;  %974 = vmatprep.subr.bf16.mxu1 %v1559_v29  ;;  %v1574_v27 = vld [vmem:[%s2101_s3 + $0x230] ss:$8 sps:$4 sm:$0xff]   ;;  %v1393_v29 = vpack.c.bf16 %v344_v18, %v345_v26 }
  0x41   : > { %1027 = vmatprep.subr.bf16.mxu0 %v1561_v36  ;;  %v1588_v36 = vld [vmem:[%s2101_s3 + $0x274] ss:$8 sps:$4 sm:$0xff]  }
  0x43   : > { %975 = vmatpush1.bf16.msra.mxu1 %v1563_v38  ;;  %v1586_v38 = vld [vmem:[%s2101_s3 + $0x270] ss:$8 sps:$4 sm:$0xff]  }
  0x44   : > { %1028 = vmatpush1.bf16.msra.mxu0 %v1564_v39  ;;  %1412 = vmatprep.subr.bf16.mxu1 %v1567_v41  ;;  %v1591_v39 = vld [vmem:[%s2101_s3 + $0x284] ss:$8 sps:$4 sm:$0xff]  }
  0x45   : > { %1050 = vmatprep.subr.bf16.mxu0 %v1567_v41  ;;  %v1594_v41 = vld [vmem:[%s2101_s3 + $0x294] ss:$8 sps:$4 sm:$0xff]  }
  0x46   : > { %1391 = vmatmul.mubr.msk.bf16.vlgmr.msra.gmra.mrb[0].mxu1 %vm1902_vm4, %v1390_v43  ;;  %v1597_v43 = vld [vmem:[%s2101_s3 + $0x2a4] ss:$8 sps:$4 sm:$0xff]  }
  0x47   : > { %1030 = vmatmul.mubr.bf16.vlgmr.msra.gmra.mrb[0].mxu0 %v358_v44  ;;  %1428 = vmatpush1.bf16.msra.mxu1 %v1565_v48  ;;  %v1595_v44 = vld [vmem:[%s2101_s3 + $0x2a0] ss:$8 sps:$4 sm:$0xff]  }
  0x48   : > { %1051 = vmatpush1.bf16.msra.mxu0 %v1565_v48  ;;  %1413 = vmatprep.subr.bf16.mxu1 %v1570_v51  ;;  %v1601_v48 = vld [vmem:[%s2101_s3 + $0x2c0] ss:$8 sps:$4 sm:$0xff]  }
  0x49   : > { %1052 = vmatprep.subr.bf16.mxu0 %v1570_v51  ;;  %1039 = vmatprep.mubr.bf16.mxu0 %v365_v10  ;;  %v1609_v51 = vld [vmem:[%s2101_s3 + $0x2e4] ss:$8 sps:$4 sm:$0xff]  }
  0x4a   : > { %986 = vmatprep.mubr.bf16.mxu1 %v363_v21 }
  0x4b   : > { %1429 = vmatpush1.bf16.msra.mxu1 %v1568_v58 }
  0x4c   : > { %1053 = vmatpush1.bf16.msra.mxu0 %v1568_v58  ;;  %1414 = vmatprep.subr.bf16.mxu1 %v1573_v63 }
  0x4d   : > { %1054 = vmatprep.subr.bf16.mxu0 %v1573_v63 }
  0x4e   : > { %987 = vmatmul.mubr.bf16.gmra.mrb[4].mxu1 %v362_v24 }
  0x4f   : > { %1040 = vmatmul.mubr.bf16.gmra.mrb[4].mxu0 %v364_v17  ;;  %1430 = vmatpush1.bf16.msra.mxu1 %v1571_v8 }
  0x50   : > { %1055 = vmatpush1.bf16.msra.mxu0 %v1571_v8  ;;  %1415 = vmatprep.subr.bf16.mxu1 %v1576_v13 }
  0x51   : > { %1056 = vmatprep.subr.bf16.mxu0 %v1576_v13  ;;  %1082 = vmatprep.mubr.bf16.mxu0 %v361_v25 }
  0x52   : > { %1394 = vmatprep.mubr.msk.bf16.mxu1 %vm2000_vm5, %v1393_v29 }
  0x53   : > { %1431 = vmatpush1.bf16.msra.mxu1 %v1574_v27 }
  0x54   : > { %1057 = vmatpush1.bf16.msra.mxu0 %v1574_v27  ;;  %1416 = vmatprep.subr.bf16.mxu1 %v1579_v23 }
  0x55   : > { %1058 = vmatprep.subr.bf16.mxu0 %v1579_v23 }
  0x57   : > { %1432 = vmatpush1.bf16.msra.mxu1 %v1577_v31 }
  0x58   : > { %1059 = vmatpush1.bf16.msra.mxu0 %v1577_v31  ;;  %1417 = vmatprep.subr.bf16.mxu1 %v1582_v32 }
  0x59   : > { %1060 = vmatprep.subr.bf16.mxu0 %v1582_v32 }
  0x5b   : > { %1433 = vmatpush1.bf16.msra.mxu1 %v1580_v33 }
  0x5c   : > { %1061 = vmatpush1.bf16.msra.mxu0 %v1580_v33  ;;  %1418 = vmatprep.subr.bf16.mxu1 %v1585_v34 }
  0x5d   : > { %1062 = vmatprep.subr.bf16.mxu0 %v1585_v34 }
  0x5f   : > { %1434 = vmatpush1.bf16.msra.mxu1 %v1583_v35 }
  0x60   : > { %1063 = vmatpush1.bf16.msra.mxu0 %v1583_v35  ;;  %1419 = vmatprep.subr.bf16.mxu1 %v1588_v36 }
  0x61   : > { %1064 = vmatprep.subr.bf16.mxu0 %v1588_v36 }
  0x63   : > { %1435 = vmatpush1.bf16.msra.mxu1 %v1586_v38 }
  0x64   : > { %1065 = vmatpush1.bf16.msra.mxu0 %v1586_v38  ;;  %1420 = vmatprep.subr.bf16.mxu1 %v1591_v39 }
  0x65   : > { %1066 = vmatprep.subr.bf16.mxu0 %v1591_v39 }
  0x67   : > { %1436 = vmatpush1.bf16.msra.mxu1 %v1589_v40 }
  0x68   : > { %1067 = vmatpush1.bf16.msra.mxu0 %v1589_v40  ;;  %1421 = vmatprep.subr.bf16.mxu1 %v1594_v41 }
  0x69   : > { %1068 = vmatprep.subr.bf16.mxu0 %v1594_v41 }
  0x6b   : > { %1437 = vmatpush1.bf16.msra.mxu1 %v1592_v42 }
  0x6c   : > { %1069 = vmatpush1.bf16.msra.mxu0 %v1592_v42  ;;  %1422 = vmatprep.subr.bf16.mxu1 %v1597_v43 }
  0x6d   : > { %1070 = vmatprep.subr.bf16.mxu0 %v1597_v43 }
  0x6f   : > { %1438 = vmatpush1.bf16.msra.mxu1 %v1595_v44 }
  0x70   : > { %1071 = vmatpush1.bf16.msra.mxu0 %v1595_v44  ;;  %1423 = vmatprep.subr.bf16.mxu1 %v1600_v45 }
  0x71   : > { %1072 = vmatprep.subr.bf16.mxu0 %v1600_v45 }
  0x73   : > { %1439 = vmatpush1.bf16.msra.mxu1 %v1598_v46 }
  0x74   : > { %1073 = vmatpush1.bf16.msra.mxu0 %v1598_v46  ;;  %1424 = vmatprep.subr.bf16.mxu1 %v1603_v47 }
  0x75   : > { %1074 = vmatprep.subr.bf16.mxu0 %v1603_v47 }
  0x77   : > { %1440 = vmatpush1.bf16.msra.mxu1 %v1601_v48 }
  0x78   : > { %1075 = vmatpush1.bf16.msra.mxu0 %v1601_v48  ;;  %1425 = vmatprep.subr.bf16.mxu1 %v1606_v49 }
  0x79   : > { %1076 = vmatprep.subr.bf16.mxu0 %v1606_v49 }
  0x7b   : > { %1441 = vmatpush1.bf16.msra.mxu1 %v1604_v50 }
  0x7c   : > { %1077 = vmatpush1.bf16.msra.mxu0 %v1604_v50  ;;  %1426 = vmatprep.subr.bf16.mxu1 %v1609_v51 }
  0x7d   : > { %1078 = vmatprep.subr.bf16.mxu0 %v1609_v51 }
  0x7f   : > { %1442 = vmatpush1.bf16.msra.mxu1 %v1607_v53 }
  0x80   : > { %1079 = vmatpush1.bf16.msra.mxu0 %v1607_v53  ;;  %1427 = vmatprep.subr.bf16.mxu1 %v1612_v54 }
  0x81   : > { %1080 = vmatprep.subr.bf16.mxu0 %v1612_v54 }
  0x83   : > { %1443 = vmatpush1.bf16.msra.mxu1 %v1610_v55 }
  0x84   : > { %1081 = vmatpush1.bf16.msra.mxu0 %v1610_v55 }
  0x86   : > { %1397 = vmatmul.mubr.msk.bf16.vlgmr.msra.gmra.mrb[8].mxu1 %vm2000_vm5, %v1396_v57 }
  0x87   : > { %1083 = vmatmul.mubr.bf16.vlgmr.msra.gmra.mrb[0].mxu0 %v360_v28 }
 0x119   : > { %v978_v58 = vpop.f32.mrb[0].mxu1 }
 0x11a   : > { %v980_v59 = vpop.f32.mrb[1].mxu1 }
 0x11b   : > { %v982_v61 = vpop.f32.mrb[2].mxu1 }
 0x11c   : > { %v984_v60 = vpop.f32.mrb[3].mxu1 }
 0x121   : > { %v988_v4 = vpop.f32.mrb[4].mxu1 }
 0x122   : > { %v1041_v62 = vpop.f32.mrb[4].mxu0  ;;  %v990_v6 = vpop.f32.mrb[5].mxu1 }
 0x123   : > { %v1043_v63 = vpop.f32.mrb[5].mxu0  ;;  %v1042_v5 = vadd.f32 %v1041_v62, %v988_v4  ;;  %v992_v0 = vpop.f32.mrb[6].mxu1 }
 0x124   : > { %v1045_v2 = vpop.f32.mrb[6].mxu0  ;;  %v1044_v1 = vadd.f32 %v1043_v63, %v990_v6  ;;  %v994_v37 = vpop.f32.mrb[7].mxu1 }
 0x125   : > { %v1047_v3 = vpop.f32.mrb[7].mxu0  ;;  %v1046_v7 = vadd.f32 %v1045_v2, %v992_v0 }
 0x126   : > { %v1048_v8 = vadd.f32 %v1047_v3, %v994_v37 }
 0x159   : > { %v1094_v10 = vpop.f32.mrb[8].mxu1 }
 0x15a   : > { %v1084_v9 = vpop.f32.mrb[0].mxu0  ;;  %v1095_v12 = vadd.f32 %v1094_v10, %v1042_v5  ;;  %v1096_v14 = vpop.f32.mrb[9].mxu1 }
 0x15b   : > { %v1444_v11 = vadd.f32 %v1084_v9, %v978_v58  ;;  %v1086_v13 = vpop.f32.mrb[1].mxu0  ;;  %v1097_v17 = vadd.f32 %v1096_v14, %v1044_v1  ;;  %v1098_v19 = vpop.f32.mrb[10].mxu1 }
 0x15c   : > { %v1445_v15 = vadd.f32 %v1086_v13, %v980_v59  ;;  %v1088_v18 = vpop.f32.mrb[2].mxu0  ;;  %v1099_v22 = vadd.f32 %v1098_v19, %v1046_v7  ;;  %v1100_v21 = vpop.f32.mrb[11].mxu1  ;;  %v1125_v29 = vmul.f32 %v1095_v12, %v1095_v12 }
 0x15d   : > { %v1446_v20 = vadd.f32 %v1088_v18, %v982_v61  ;;  %v1090_v16 = vpop.f32.mrb[3].mxu0  ;;  %v1410_v25 = vpack.c.bf16 %v1097_v17, %v1095_v12  ;;  %v1121_v26 = vmul.f32 %v1444_v11, %v1444_v11  ;;  %v1101_v31 = vadd.f32 %v1100_v21, %v1048_v8 }
 0x15e   : > { %v1408_v24 = vpack.c.bf16 %v1445_v15, %v1444_v11  ;;  %v1447_v23 = vadd.f32 %v1090_v16, %v984_v60  ;;  %v1122_v30 = vmul.f32 %v1445_v15, %v1445_v15  ;;  %v1126_v36 = vmul.f32 %v1097_v17, %v1097_v17 }
 0x15f   : > { %v1103_v27 = vadd.f32 %v1446_v20, %v1444_v11  ;;  %v1123_v28 = vmul.f32 %v1446_v20, %v1446_v20  ;;  %1187 = vst [vmem:[%s232_s22 + $0x10] sm:$0xff] %v1410_v25  ;;  %v1127_v38 = vmul.f32 %v1099_v22, %v1099_v22  ;;  %v1411_v40 = vpack.c.bf16 %v1101_v31, %v1099_v22 }
 0x160   : > { %1185 = vst [vmem:[%s232_s22] sm:$0xff] %v1408_v24  ;;  %v1112_v34 = vadd.f32 %v1447_v23, %v1445_v15  ;;  %v1124_v35 = vmul.f32 %v1447_v23, %v1447_v23  ;;  %v1409_v39 = vpack.c.bf16 %v1447_v23, %v1446_v20  ;;  %v1128_v45 = vmul.f32 %v1101_v31, %v1101_v31 }
 0x161   : > { %v1129_v32 = vadd.f32 %v1123_v28, %v1121_v26  ;;  %v1104_v33 = vadd.f32 %v1103_v27, %v1095_v12  ;;  %1188 = vst [vmem:[%s232_s22 + $0x18] sm:$0xff] %v1411_v40 }
 0x162   : > { %v1138_v43 = vadd.f32 %v1124_v35, %v1122_v30  ;;  %v1113_v44 = vadd.f32 %v1112_v34, %v1097_v17  ;;  %1186 = vst [vmem:[%s232_s22 + $0x8] sm:$0xff] %v1409_v39 }
 0x163   : > { %v1105_v41 = vadd.f32 %v1104_v33, %v1099_v22  ;;  %v1130_v42 = vadd.f32 %v1129_v32, %v1125_v29 }
 0x164   : > { %v1114_v48 = vadd.f32 %v1113_v44, %v1101_v31  ;;  %v1139_v49 = vadd.f32 %v1138_v43, %v1126_v36 }
 0x165   : > { %v1106_v46 = vrot.slane %v1105_v41, 4  ;;  %v1131_v47 = vadd.f32 %v1130_v42, %v1127_v38 }
 0x166   : > { %v1115_v52 = vrot.slane %v1114_v48, 4  ;;  %v1140_v53 = vadd.f32 %v1139_v49, %v1128_v45 }
 0x167   : > { %v1107_v50 = vadd.f32 %v1106_v46, %v1105_v41  ;;  %v1132_v51 = vrot.slane %v1131_v47, 4 }
 0x168   : > { %v1116_v56 = vadd.f32 %v1115_v52, %v1114_v48  ;;  %v1141_v57 = vrot.slane %v1140_v53, 4 }
 0x169   : > { %v1108_v54 = vrot.slane %v1107_v50, 2  ;;  %v1133_v55 = vadd.f32 %v1132_v51, %v1131_v47 }
 0x16a   : > { %v1117_v61 = vrot.slane %v1116_v56, 2  ;;  %v1142_v60 = vadd.f32 %v1141_v57, %v1140_v53 }
 0x16b   : > { %v1109_v58 = vadd.f32 %v1108_v54, %v1107_v50  ;;  %v1134_v59 = vrot.slane %v1133_v55, 2 }
 0x16c   : > { %v1118_v2 = vadd.f32 %v1117_v61, %v1116_v56  ;;  %v1143_v3 = vrot.slane %v1142_v60, 2 }
 0x16d   : > { %v1110_v62 = vrot.slane %v1109_v58, 1  ;;  %v1135_v63 = vadd.f32 %v1134_v59, %v1133_v55 }
 0x16e   : > { %v1119_v5 = vrot.slane %v1118_v2, 1  ;;  %v1144_v6 = vadd.f32 %v1143_v3, %v1142_v60 }
 0x16f   : > { %v1136_v4 = vrot.slane %v1135_v63, 1  ;;  %v1111_v1 = vadd.f32 %v1110_v62, %v1109_v58 }
 0x170   : > { %v1145_v7 = vrot.slane %v1144_v6, 1  ;;  %v1120_v8 = vadd.f32 %v1119_v5, %v1118_v2 }
 0x171   : > { %v1137_v0 = vadd.f32 %v1136_v4, %v1135_v63 }
 0x172   : > { %v1146_v9 = vadd.f32 %v1145_v7, %v1144_v6 }
 0x173   : > { %v1147_v37 = vsel %vm306_vm0, %v1111_v1, %v1137_v0 }
 0x174   : > { %v1148_v10 = vsel %vm306_vm0, %v1120_v8, %v1146_v9 }
 0x175   : > { %v1151_v11 = vcombine.low %v1147_v37, %v1148_v10 }
 0x177   : > { %1398 = vst.sshfl [vmem:[%s237_s25] sm:$0x33 pattern:$0x76325410] %v1151_v11 }
 0x178 PF: > { %s16_s18 = sadd.s32 1, %s1619_s18  }
 0x179   : > { %p13_p4 = scmp.ge.s32.totalorder %s16_s18, 4  }
 0x17b   :  { %15 = sbr.rel (!%p13_p4) target bundleno = 1 (0x1), region = 78 }

</bundles_post_ra>
